<compile_context>
chip_gen: v7x
topology: tpu7x:2x2x1
jax: 0.10.0
libtpu: 0.0.40
codegen_flags: <defaults>
</compile_context>

<pallas_src>
import functools

import jax
import jax.numpy as jnp
from jax.experimental import pallas as pl
from jax.experimental.pallas import tpu as pltpu

cfgs = {
    'A': [[64, 'M'], [128, 'M'], [256, 256, 'M'], [512, 512, 'M'], [512, 512, 'M']],
    'B': [[64, 64, 'M'], [128, 128, 'M'], [256, 256, 'M'], [512, 512, 'M'], [512, 512, 'M']],
    'D': [[64, 64, 'M'], [128, 128, 'M'], [256, 256, 256, 'M'], [512, 512, 512, 'M'], [512, 512, 512, 'M']],
    'E': [[64, 64, 'M'], [128, 128, 'M'], [256, 256, 256, 256, 'M'], [512, 512, 512, 512, 'M'],
          [512, 512, 512, 512, 'M']],
}

# Fits every generation (v7x has only 64 MiB physical VMEM per TensorCore).
_VMEM_LIMIT = 48 * 1024 * 1024


def _pad128(c):
    return ((c + 127) // 128) * 128


# --------------------------------------------------------------------------- #
# Conv 3x3 (pad=1) + folded BatchNorm + ReLU (+ optional fused MaxPool 2x2)
# --------------------------------------------------------------------------- #
def _conv_kernel(xp_ref, w_ref, s_ref, b_ref, o_ref, patch_ref, row_ref,
                 *, pool, cin_p, w_out):
    # xp_ref  : (1, H+2, W+2, cin_p) bf16 padded image (resident across row steps)
    # w_ref   : (9*cin_p, cout)      bf16 3x3 kernel flattened along (dy, dx, cin)
    # s_ref   : (1, cout) f32 folded BN scale ; b_ref: (1, cout) f32 folded bias
    # o_ref   : pool -> (1, 1, W/2, cout) bf16 ; else -> (1, 2, W, cout) bf16
    # patch_ref: VMEM (W, 9*cin_p) bf16   im2col patch for one output row
    # row_ref  : VMEM (W, cout)    f32    H-direction max (only used when pool)
    j = pl.program_id(1)
    r0 = j * 2
    for rr in range(2):                       # two conv rows per grid step
        for dy in range(3):
            for dx in range(3):
                t = dy * 3 + dx
                patch_ref[:, t * cin_p:(t + 1) * cin_p] = (
                    xp_ref[0, r0 + rr + dy, pl.ds(dx, w_out), :])
        acc = jnp.dot(patch_ref[...], w_ref[...],
                      preferred_element_type=jnp.float32)        # (W, cout) f32
        y = jnp.maximum(acc * s_ref[...] + b_ref[...], 0.0)
        if pool:
            if rr == 0:
                row_ref[...] = y
            else:
                row_ref[...] = jnp.maximum(row_ref[...], y)
        else:
            o_ref[0, rr] = y.astype(o_ref.dtype)
    if pool:
        wo = o_ref.shape[2]
        even = row_ref[pl.ds(0, wo, 2), :]    # strided sublane reads for 2x2 pool
        odd = row_ref[pl.ds(1, wo, 2), :]
        o_ref[0, 0] = jnp.maximum(even, odd).astype(o_ref.dtype)


def conv3x3_bn_relu(x, w, scale, bias, pool):
    # x: (N, H, W, cin_p) bf16 ; w: (9*cin_p, cout) bf16 ; scale/bias: (1, cout) f32
    n, h, wd, cin_p = x.shape
    cout = w.shape[-1]
    xp = jnp.pad(x, ((0, 0), (1, 1), (1, 1), (0, 0)))
    hp, wp = h + 2, wd + 2
    n_steps = h // 2
    if pool:
        ho, wo = h // 2, wd // 2
        out_shape = jax.ShapeDtypeStruct((n, ho, wo, cout), jnp.bfloat16)
        out_spec = pl.BlockSpec((1, 1, wo, cout), lambda i, j: (i, j, 0, 0))
    else:
        out_shape = jax.ShapeDtypeStruct((n, h, wd, cout), jnp.bfloat16)
        out_spec = pl.BlockSpec((1, 2, wd, cout), lambda i, j: (i, j, 0, 0))
    kern = functools.partial(_conv_kernel, pool=pool, cin_p=cin_p, w_out=wd)
    return pl.pallas_call(
        kern,
        out_shape=out_shape,
        grid_spec=pltpu.PrefetchScalarGridSpec(
            num_scalar_prefetch=0,
            grid=(n, n_steps),
            in_specs=[
                pl.BlockSpec((1, hp, wp, cin_p), lambda i, j: (i, 0, 0, 0)),
                pl.BlockSpec((9 * cin_p, cout), lambda i, j: (0, 0)),
                pl.BlockSpec((1, cout), lambda i, j: (0, 0)),
                pl.BlockSpec((1, cout), lambda i, j: (0, 0)),
            ],
            out_specs=out_spec,
            scratch_shapes=[
                pltpu.VMEM((wd, 9 * cin_p), jnp.bfloat16),
                pltpu.VMEM((wd, cout), jnp.float32),
            ],
        ),
        compiler_params=pltpu.CompilerParams(
            dimension_semantics=("parallel", "arbitrary"),
            vmem_limit_bytes=_VMEM_LIMIT,
        ),
    )(xp, w, scale, bias)


# --------------------------------------------------------------------------- #
# Linear (+ optional ReLU), K-tiled matmul with resident accumulator
# --------------------------------------------------------------------------- #
def _linear_kernel(x_ref, w_ref, b_ref, o_ref, acc_ref, *, relu):
    k = pl.program_id(0)

    @pl.when(k == 0)
    def _():
        acc_ref[...] = jnp.zeros_like(acc_ref)

    acc_ref[...] += jnp.dot(x_ref[...], w_ref[...],
                            preferred_element_type=jnp.float32)

    @pl.when(k == pl.num_programs(0) - 1)
    def _():
        y = acc_ref[...] + b_ref[...]
        if relu:
            y = jnp.maximum(y, 0.0)
        o_ref[...] = y.astype(o_ref.dtype)


def _pick_tk(k, max_tk=2048):
    if k <= max_tk:
        return k
    for cand in range(max_tk, 0, -128):
        if k % cand == 0:
            return cand
    return k


def linear(x, w, b, relu, out_dtype):
    bsz, k = x.shape
    nout = w.shape[1]
    tk = _pick_tk(k)
    nk = k // tk
    kern = functools.partial(_linear_kernel, relu=relu)
    flops = 2 * bsz * k * nout
    bytes_accessed = int(x.size) * x.dtype.itemsize + int(w.size) * w.dtype.itemsize \
        + nout * 4 + bsz * nout * jnp.dtype(out_dtype).itemsize
    return pl.pallas_call(
        kern,
        out_shape=jax.ShapeDtypeStruct((bsz, nout), out_dtype),
        grid_spec=pltpu.PrefetchScalarGridSpec(
            num_scalar_prefetch=0,
            grid=(nk,),
            in_specs=[
                pl.BlockSpec((bsz, tk), lambda kk: (0, kk)),
                pl.BlockSpec((tk, nout), lambda kk: (kk, 0)),
                pl.BlockSpec((1, nout), lambda kk: (0, 0)),
            ],
            out_specs=pl.BlockSpec((bsz, nout), lambda kk: (0, 0)),
            scratch_shapes=[pltpu.VMEM((bsz, nout), jnp.float32)],
        ),
        compiler_params=pltpu.CompilerParams(
            dimension_semantics=("arbitrary",),
            vmem_limit_bytes=_VMEM_LIMIT,
        ),
        cost_estimate=pl.CostEstimate(flops=flops, transcendentals=0,
                                      bytes_accessed=bytes_accessed),
    )(x, w, b.reshape(1, nout))


# --------------------------------------------------------------------------- #
# Adaptive average pool (XLA glue: tiny data-dependent windows, PyTorch formula)
# --------------------------------------------------------------------------- #
def adaptive_avg_pool_nhwc(x, oh, ow):
    # TODO(synk): data-dependent tiny pooling windows kept as XLA glue (negligible).
    n, h, w, c = x.shape
    xf = x.astype(jnp.float32)
    rows = []
    for i in range(oh):
        h0, h1 = (i * h) // oh, -(-((i + 1) * h) // oh)
        cols = []
        for j in range(ow):
            w0, w1 = (j * w) // ow, -(-((j + 1) * w) // ow)
            cols.append(jnp.mean(xf[:, h0:h1, w0:w1, :], axis=(1, 2)))
        rows.append(jnp.stack(cols, axis=1))
    return jnp.stack(rows, axis=1).astype(x.dtype)  # (N, oh, ow, C)


# --------------------------------------------------------------------------- #
# Parameters (deterministic, synthetic)
# --------------------------------------------------------------------------- #
def make_params(key, cfg, num_classes=10):
    params = {'stages': []}
    cin = 3
    eps = 1e-5
    for stage_cfg in cfg:
        convs = [v for v in stage_cfg if v != 'M']
        stage = []
        for idx, v in enumerate(convs):
            cin_p, cout_p = _pad128(cin), _pad128(v)
            key, k1, k2, k3, k4 = jax.random.split(key, 5)
            w = jax.random.normal(k1, (3, 3, cin, v), jnp.float32) * jnp.sqrt(2.0 / (9 * cin))
            conv_b = jnp.zeros((v,), jnp.float32)
            gamma = 1.0 + 0.1 * jax.random.normal(k2, (v,), jnp.float32)
            beta = 0.1 * jax.random.normal(k3, (v,), jnp.float32)
            rmean = 0.1 * jax.random.normal(k4, (v,), jnp.float32)
            rvar = jnp.ones((v,), jnp.float32)
            scale = gamma / jnp.sqrt(rvar + eps)
            bias = (conv_b - rmean) * scale + beta
            # zero-pad channels to lane-aligned widths (padded outputs stay exactly 0)
            w_p = jnp.zeros((3, 3, cin_p, cout_p), jnp.float32).at[:, :, :cin, :v].set(w)
            scale_p = jnp.zeros((cout_p,), jnp.float32).at[:v].set(scale)
            bias_p = jnp.zeros((cout_p,), jnp.float32).at[:v].set(bias)
            stage.append({
                'w': w_p.reshape(9 * cin_p, cout_p).astype(jnp.bfloat16),
                'scale': scale_p.reshape(1, cout_p),
                'bias': bias_p.reshape(1, cout_p),
                'pool': idx == len(convs) - 1,   # every VGG stage ends with 'M'
            })
            cin = v
        params['stages'].append(stage)
    params['cin0_p'] = _pad128(3)
    key, k1, k2, k3 = jax.random.split(key, 4)
    params['fc1_w'] = (0.01 * jax.random.normal(k1, (512 * 7 * 7, 4096), jnp.float32)).astype(jnp.bfloat16)
    params['fc1_b'] = jnp.zeros((4096,), jnp.float32)
    params['fc2_w'] = (0.01 * jax.random.normal(k2, (4096, 4096), jnp.float32)).astype(jnp.bfloat16)
    params['fc2_b'] = jnp.zeros((4096,), jnp.float32)
    params['cls_w'] = (0.01 * jax.random.normal(k3, (4096, num_classes), jnp.float32)).astype(jnp.bfloat16)
    params['cls_b'] = jnp.zeros((num_classes,), jnp.float32)
    return params


# --------------------------------------------------------------------------- #
# Forward pass (matches VGG.forward)
# --------------------------------------------------------------------------- #
def vgg_forward(params, x_nchw):
    x = jnp.transpose(x_nchw, (0, 2, 3, 1)).astype(jnp.bfloat16)   # NCHW -> NHWC
    x = jnp.pad(x, ((0, 0), (0, 0), (0, 0), (0, params['cin0_p'] - x.shape[-1])))
    for stage in params['stages']:                                  # layer1..layer5
        for conv in stage:
            x = conv3x3_bn_relu(x, conv['w'], conv['scale'], conv['bias'],
                                pool=conv['pool'])
    x = adaptive_avg_pool_nhwc(x, 7, 7)                             # (N, 7, 7, 512)
    n = x.shape[0]
    x = jnp.transpose(x, (0, 3, 1, 2)).reshape(n, -1)               # torch.flatten(NCHW, 1)
    x = linear(x, params['fc1_w'], params['fc1_b'], relu=True, out_dtype=jnp.bfloat16)
    # TODO(synk): nn.Dropout is identity here (inference semantics).
    x = linear(x, params['fc2_w'], params['fc2_b'], relu=True, out_dtype=jnp.bfloat16)
    # TODO(synk): second Dropout likewise identity.
    x = linear(x, params['cls_w'], params['cls_b'], relu=False, out_dtype=jnp.float32)
    return x


if __name__ == "__main__":
    key = jax.random.PRNGKey(0)
    kp, kx = jax.random.split(key)
    params = make_params(kp, cfgs['A'], num_classes=10)
    x = jax.random.normal(kx, (2, 3, 32, 32), jnp.float32)  # small CIFAR-like input
    out = vgg_forward(params, x)
    out = jax.block_until_ready(out)
    assert out.shape == (2, 10) and out.dtype == jnp.float32
    print("KERNEL_OK")
</pallas_src>

<mosaic_0001>
module attributes {stable_mosaic.version = 11 : i64} {
  func.func @_conv_kernel(%arg0: i32, %arg1: i32, %arg2: memref<1x34x34x128xbf16, #tpu.memory_space<vmem>>, %arg3: memref<1152x128xbf16, #tpu.memory_space<vmem>>, %arg4: memref<1x128xf32, #tpu.memory_space<vmem>>, %arg5: memref<1x128xf32, #tpu.memory_space<vmem>>, %arg6: memref<1x1x16x128xbf16, #tpu.memory_space<vmem>>, %arg7: memref<32x1152xbf16, #tpu.memory_space<vmem>>, %arg8: memref<32x128xf32, #tpu.memory_space<vmem>>) attributes {dimension_semantics = [#tpu.dimension_semantics<parallel>, #tpu.dimension_semantics<arbitrary>], iteration_bounds = array<i64: 2, 16>, scalar_prefetch = 0 : i64, scratch_operands = 2 : i64, tpu.core_type = #tpu.core_type<tc>, window_params = [{transform_indices = @transform_0, window_bounds = array<i64: 1, 34, 34, 128>}, {pipeline_mode = #tpu.pipeline_mode<synchronous>, transform_indices = @transform_1, window_bounds = array<i64: 1152, 128>}, {pipeline_mode = #tpu.pipeline_mode<synchronous>, transform_indices = @transform_2, window_bounds = array<i64: 1, 128>}, {pipeline_mode = #tpu.pipeline_mode<synchronous>, transform_indices = @transform_3, window_bounds = array<i64: 1, 128>}, {transform_indices = @transform_4, window_bounds = array<i64: 1, 1, 16, 128>}]} {
    %c2_i32 = arith.constant 2 : i32
    %0 = arith.muli %arg1, %c2_i32 : i32
    %c0_i32 = arith.constant 0 : i32
    %1 = arith.addi %0, %c0_i32 : i32
    %c0_i32_0 = arith.constant 0 : i32
    %2 = arith.addi %1, %c0_i32_0 : i32
    %c0 = arith.constant 0 : index
    %3 = arith.index_cast %2 : i32 to index
    %c0_1 = arith.constant 0 : index
    %c0_2 = arith.constant 0 : index
    %4 = vector.load %arg2[%c0, %3, %c0_1, %c0_2] : memref<1x34x34x128xbf16, #tpu.memory_space<vmem>>, vector<1x1x32x128xbf16>
    %5 = vector.shape_cast %4 : vector<1x1x32x128xbf16> to vector<32x128xbf16>
    %c0_3 = arith.constant 0 : index
    %c0_4 = arith.constant 0 : index
    %6 = vector.load %arg7[%c0_3, %c0_4] : memref<32x1152xbf16, #tpu.memory_space<vmem>>, vector<32x128xbf16>
    tpu.vector_store %arg7[%c0_3, %c0_4], %5 {strides = array<i32>} : memref<32x1152xbf16, #tpu.memory_space<vmem>>, vector<32x128xbf16>,
    %c0_i32_5 = arith.constant 0 : i32
    %7 = arith.addi %0, %c0_i32_5 : i32
    %c0_i32_6 = arith.constant 0 : i32
    %8 = arith.addi %7, %c0_i32_6 : i32
    %c0_7 = arith.constant 0 : index
    %9 = arith.index_cast %8 : i32 to index
    %c1 = arith.constant 1 : index
    %c0_8 = arith.constant 0 : index
    %10 = vector.load %arg2[%c0_7, %9, %c1, %c0_8] : memref<1x34x34x128xbf16, #tpu.memory_space<vmem>>, vector<1x1x32x128xbf16>
    %11 = vector.shape_cast %10 : vector<1x1x32x128xbf16> to vector<32x128xbf16>
    %c0_9 = arith.constant 0 : index
    %c128 = arith.constant 128 : index
    %12 = vector.load %arg7[%c0_9, %c128] : memref<32x1152xbf16, #tpu.memory_space<vmem>>, vector<32x128xbf16>
    tpu.vector_store %arg7[%c0_9, %c128], %11 {strides = array<i32>} : memref<32x1152xbf16, #tpu.memory_space<vmem>>, vector<32x128xbf16>,
    %c0_i32_10 = arith.constant 0 : i32
    %13 = arith.addi %0, %c0_i32_10 : i32
    %c0_i32_11 = arith.constant 0 : i32
    %14 = arith.addi %13, %c0_i32_11 : i32
    %c0_12 = arith.constant 0 : index
    %15 = arith.index_cast %14 : i32 to index
    %c2 = arith.constant 2 : index
    %c0_13 = arith.constant 0 : index
    %16 = vector.load %arg2[%c0_12, %15, %c2, %c0_13] : memref<1x34x34x128xbf16, #tpu.memory_space<vmem>>, vector<1x1x32x128xbf16>
    %17 = vector.shape_cast %16 : vector<1x1x32x128xbf16> to vector<32x128xbf16>
    %c0_14 = arith.constant 0 : index
    %c256 = arith.constant 256 : index
    %18 = vector.load %arg7[%c0_14, %c256] : memref<32x1152xbf16, #tpu.memory_space<vmem>>, vector<32x128xbf16>
    tpu.vector_store %arg7[%c0_14, %c256], %17 {strides = array<i32>} : memref<32x1152xbf16, #tpu.memory_space<vmem>>, vector<32x128xbf16>,
    %c0_i32_15 = arith.constant 0 : i32
    %19 = arith.addi %0, %c0_i32_15 : i32
    %c1_i32 = arith.constant 1 : i32
    %20 = arith.addi %19, %c1_i32 : i32
    %c0_16 = arith.constant 0 : index
    %21 = arith.index_cast %20 : i32 to index
    %c0_17 = arith.constant 0 : index
    %c0_18 = arith.constant 0 : index
    %22 = vector.load %arg2[%c0_16, %21, %c0_17, %c0_18] : memref<1x34x34x128xbf16, #tpu.memory_space<vmem>>, vector<1x1x32x128xbf16>
    %23 = vector.shape_cast %22 : vector<1x1x32x128xbf16> to vector<32x128xbf16>
    %c0_19 = arith.constant 0 : index
    %c384 = arith.constant 384 : index
    %24 = vector.load %arg7[%c0_19, %c384] : memref<32x1152xbf16, #tpu.memory_space<vmem>>, vector<32x128xbf16>
    tpu.vector_store %arg7[%c0_19, %c384], %23 {strides = array<i32>} : memref<32x1152xbf16, #tpu.memory_space<vmem>>, vector<32x128xbf16>,
    %c0_i32_20 = arith.constant 0 : i32
    %25 = arith.addi %0, %c0_i32_20 : i32
    %c1_i32_21 = arith.constant 1 : i32
    %26 = arith.addi %25, %c1_i32_21 : i32
    %c0_22 = arith.constant 0 : index
    %27 = arith.index_cast %26 : i32 to index
    %c1_23 = arith.constant 1 : index
    %c0_24 = arith.constant 0 : index
    %28 = vector.load %arg2[%c0_22, %27, %c1_23, %c0_24] : memref<1x34x34x128xbf16, #tpu.memory_space<vmem>>, vector<1x1x32x128xbf16>
    %29 = vector.shape_cast %28 : vector<1x1x32x128xbf16> to vector<32x128xbf16>
    %c0_25 = arith.constant 0 : index
    %c512 = arith.constant 512 : index
    %30 = vector.load %arg7[%c0_25, %c512] : memref<32x1152xbf16, #tpu.memory_space<vmem>>, vector<32x128xbf16>
    tpu.vector_store %arg7[%c0_25, %c512], %29 {strides = array<i32>} : memref<32x1152xbf16, #tpu.memory_space<vmem>>, vector<32x128xbf16>,
    %c0_i32_26 = arith.constant 0 : i32
    %31 = arith.addi %0, %c0_i32_26 : i32
    %c1_i32_27 = arith.constant 1 : i32
    %32 = arith.addi %31, %c1_i32_27 : i32
    %c0_28 = arith.constant 0 : index
    %33 = arith.index_cast %32 : i32 to index
    %c2_29 = arith.constant 2 : index
    %c0_30 = arith.constant 0 : index
    %34 = vector.load %arg2[%c0_28, %33, %c2_29, %c0_30] : memref<1x34x34x128xbf16, #tpu.memory_space<vmem>>, vector<1x1x32x128xbf16>
    %35 = vector.shape_cast %34 : vector<1x1x32x128xbf16> to vector<32x128xbf16>
    %c0_31 = arith.constant 0 : index
    %c640 = arith.constant 640 : index
    %36 = vector.load %arg7[%c0_31, %c640] : memref<32x1152xbf16, #tpu.memory_space<vmem>>, vector<32x128xbf16>
    tpu.vector_store %arg7[%c0_31, %c640], %35 {strides = array<i32>} : memref<32x1152xbf16, #tpu.memory_space<vmem>>, vector<32x128xbf16>,
    %c0_i32_32 = arith.constant 0 : i32
    %37 = arith.addi %0, %c0_i32_32 : i32
    %c2_i32_33 = arith.constant 2 : i32
    %38 = arith.addi %37, %c2_i32_33 : i32
    %c0_34 = arith.constant 0 : index
    %39 = arith.index_cast %38 : i32 to index
    %c0_35 = arith.constant 0 : index
    %c0_36 = arith.constant 0 : index
    %40 = vector.load %arg2[%c0_34, %39, %c0_35, %c0_36] : memref<1x34x34x128xbf16, #tpu.memory_space<vmem>>, vector<1x1x32x128xbf16>
    %41 = vector.shape_cast %40 : vector<1x1x32x128xbf16> to vector<32x128xbf16>
    %c0_37 = arith.constant 0 : index
    %c768 = arith.constant 768 : index
    %42 = vector.load %arg7[%c0_37, %c768] : memref<32x1152xbf16, #tpu.memory_space<vmem>>, vector<32x128xbf16>
    tpu.vector_store %arg7[%c0_37, %c768], %41 {strides = array<i32>} : memref<32x1152xbf16, #tpu.memory_space<vmem>>, vector<32x128xbf16>,
    %c0_i32_38 = arith.constant 0 : i32
    %43 = arith.addi %0, %c0_i32_38 : i32
    %c2_i32_39 = arith.constant 2 : i32
    %44 = arith.addi %43, %c2_i32_39 : i32
    %c0_40 = arith.constant 0 : index
    %45 = arith.index_cast %44 : i32 to index
    %c1_41 = arith.constant 1 : index
    %c0_42 = arith.constant 0 : index
    %46 = vector.load %arg2[%c0_40, %45, %c1_41, %c0_42] : memref<1x34x34x128xbf16, #tpu.memory_space<vmem>>, vector<1x1x32x128xbf16>
    %47 = vector.shape_cast %46 : vector<1x1x32x128xbf16> to vector<32x128xbf16>
    %c0_43 = arith.constant 0 : index
    %c896 = arith.constant 896 : index
    %48 = vector.load %arg7[%c0_43, %c896] : memref<32x1152xbf16, #tpu.memory_space<vmem>>, vector<32x128xbf16>
    tpu.vector_store %arg7[%c0_43, %c896], %47 {strides = array<i32>} : memref<32x1152xbf16, #tpu.memory_space<vmem>>, vector<32x128xbf16>,
    %c0_i32_44 = arith.constant 0 : i32
    %49 = arith.addi %0, %c0_i32_44 : i32
    %c2_i32_45 = arith.constant 2 : i32
    %50 = arith.addi %49, %c2_i32_45 : i32
    %c0_46 = arith.constant 0 : index
    %51 = arith.index_cast %50 : i32 to index
    %c2_47 = arith.constant 2 : index
    %c0_48 = arith.constant 0 : index
    %52 = vector.load %arg2[%c0_46, %51, %c2_47, %c0_48] : memref<1x34x34x128xbf16, #tpu.memory_space<vmem>>, vector<1x1x32x128xbf16>
    %53 = vector.shape_cast %52 : vector<1x1x32x128xbf16> to vector<32x128xbf16>
    %c0_49 = arith.constant 0 : index
    %c1024 = arith.constant 1024 : index
    %54 = vector.load %arg7[%c0_49, %c1024] : memref<32x1152xbf16, #tpu.memory_space<vmem>>, vector<32x128xbf16>
    tpu.vector_store %arg7[%c0_49, %c1024], %53 {strides = array<i32>} : memref<32x1152xbf16, #tpu.memory_space<vmem>>, vector<32x128xbf16>,
    %c0_50 = arith.constant 0 : index
    %c0_51 = arith.constant 0 : index
    %55 = vector.load %arg7[%c0_50, %c0_51] : memref<32x1152xbf16, #tpu.memory_space<vmem>>, vector<32x1152xbf16>
    %c0_52 = arith.constant 0 : index
    %c0_53 = arith.constant 0 : index
    %56 = vector.load %arg3[%c0_52, %c0_53] : memref<1152x128xbf16, #tpu.memory_space<vmem>>, vector<1152x128xbf16>
    %cst = arith.constant dense<0.000000e+00> : vector<32x128xf32>
    %57 = tpu.matmul %55, %56, %cst {dimension_numbers = #tpu.dot_dimension_numbers<[1], [0], [0], [1], [0, 0, 1, 1], [], []>} : vector<32x1152xbf16>, vector<1152x128xbf16>, vector<32x128xf32> -> vector<32x128xf32>
    %c0_54 = arith.constant 0 : index
    %c0_55 = arith.constant 0 : index
    %58 = vector.load %arg4[%c0_54, %c0_55] : memref<1x128xf32, #tpu.memory_space<vmem>>, vector<1x128xf32>
    %59 = vector.broadcast %58 : vector<1x128xf32> to vector<32x128xf32>
    %60 = arith.mulf %57, %59 : vector<32x128xf32>
    %c0_56 = arith.constant 0 : index
    %c0_57 = arith.constant 0 : index
    %61 = vector.load %arg5[%c0_56, %c0_57] : memref<1x128xf32, #tpu.memory_space<vmem>>, vector<1x128xf32>
    %62 = vector.broadcast %61 : vector<1x128xf32> to vector<32x128xf32>
    %63 = arith.addf %60, %62 : vector<32x128xf32>
    %cst_58 = arith.constant 0.000000e+00 : f32
    %64 = vector.broadcast %cst_58 : f32 to vector<32x128xf32>
    %65 = arith.maximumf %63, %64 : vector<32x128xf32>
    %c0_59 = arith.constant 0 : index
    %c0_60 = arith.constant 0 : index
    %66 = vector.load %arg8[%c0_59, %c0_60] : memref<32x128xf32, #tpu.memory_space<vmem>>, vector<32x128xf32>
    tpu.vector_store %arg8[%c0_59, %c0_60], %65 {strides = array<i32>} : memref<32x128xf32, #tpu.memory_space<vmem>>, vector<32x128xf32>,
    %c1_i32_61 = arith.constant 1 : i32
    %67 = arith.addi %0, %c1_i32_61 : i32
    %c0_i32_62 = arith.constant 0 : i32
    %68 = arith.addi %67, %c0_i32_62 : i32
    %c0_63 = arith.constant 0 : index
    %69 = arith.index_cast %68 : i32 to index
    %c0_64 = arith.constant 0 : index
    %c0_65 = arith.constant 0 : index
    %70 = vector.load %arg2[%c0_63, %69, %c0_64, %c0_65] : memref<1x34x34x128xbf16, #tpu.memory_space<vmem>>, vector<1x1x32x128xbf16>
    %71 = vector.shape_cast %70 : vector<1x1x32x128xbf16> to vector<32x128xbf16>
    %c0_66 = arith.constant 0 : index
    %c0_67 = arith.constant 0 : index
    %72 = vector.load %arg7[%c0_66, %c0_67] : memref<32x1152xbf16, #tpu.memory_space<vmem>>, vector<32x128xbf16>
    tpu.vector_store %arg7[%c0_66, %c0_67], %71 {strides = array<i32>} : memref<32x1152xbf16, #tpu.memory_space<vmem>>, vector<32x128xbf16>,
    %c1_i32_68 = arith.constant 1 : i32
    %73 = arith.addi %0, %c1_i32_68 : i32
    %c0_i32_69 = arith.constant 0 : i32
    %74 = arith.addi %73, %c0_i32_69 : i32
    %c0_70 = arith.constant 0 : index
    %75 = arith.index_cast %74 : i32 to index
    %c1_71 = arith.constant 1 : index
    %c0_72 = arith.constant 0 : index
    %76 = vector.load %arg2[%c0_70, %75, %c1_71, %c0_72] : memref<1x34x34x128xbf16, #tpu.memory_space<vmem>>, vector<1x1x32x128xbf16>
    %77 = vector.shape_cast %76 : vector<1x1x32x128xbf16> to vector<32x128xbf16>
    %c0_73 = arith.constant 0 : index
    %c128_74 = arith.constant 128 : index
    %78 = vector.load %arg7[%c0_73, %c128_74] : memref<32x1152xbf16, #tpu.memory_space<vmem>>, vector<32x128xbf16>
    tpu.vector_store %arg7[%c0_73, %c128_74], %77 {strides = array<i32>} : memref<32x1152xbf16, #tpu.memory_space<vmem>>, vector<32x128xbf16>,
    %c1_i32_75 = arith.constant 1 : i32
    %79 = arith.addi %0, %c1_i32_75 : i32
    %c0_i32_76 = arith.constant 0 : i32
    %80 = arith.addi %79, %c0_i32_76 : i32
    %c0_77 = arith.constant 0 : index
    %81 = arith.index_cast %80 : i32 to index
    %c2_78 = arith.constant 2 : index
    %c0_79 = arith.constant 0 : index
    %82 = vector.load %arg2[%c0_77, %81, %c2_78, %c0_79] : memref<1x34x34x128xbf16, #tpu.memory_space<vmem>>, vector<1x1x32x128xbf16>
    %83 = vector.shape_cast %82 : vector<1x1x32x128xbf16> to vector<32x128xbf16>
    %c0_80 = arith.constant 0 : index
    %c256_81 = arith.constant 256 : index
    %84 = vector.load %arg7[%c0_80, %c256_81] : memref<32x1152xbf16, #tpu.memory_space<vmem>>, vector<32x128xbf16>
    tpu.vector_store %arg7[%c0_80, %c256_81], %83 {strides = array<i32>} : memref<32x1152xbf16, #tpu.memory_space<vmem>>, vector<32x128xbf16>,
    %c1_i32_82 = arith.constant 1 : i32
    %85 = arith.addi %0, %c1_i32_82 : i32
    %c1_i32_83 = arith.constant 1 : i32
    %86 = arith.addi %85, %c1_i32_83 : i32
    %c0_84 = arith.constant 0 : index
    %87 = arith.index_cast %86 : i32 to index
    %c0_85 = arith.constant 0 : index
    %c0_86 = arith.constant 0 : index
    %88 = vector.load %arg2[%c0_84, %87, %c0_85, %c0_86] : memref<1x34x34x128xbf16, #tpu.memory_space<vmem>>, vector<1x1x32x128xbf16>
    %89 = vector.shape_cast %88 : vector<1x1x32x128xbf16> to vector<32x128xbf16>
    %c0_87 = arith.constant 0 : index
    %c384_88 = arith.constant 384 : index
    %90 = vector.load %arg7[%c0_87, %c384_88] : memref<32x1152xbf16, #tpu.memory_space<vmem>>, vector<32x128xbf16>
    tpu.vector_store %arg7[%c0_87, %c384_88], %89 {strides = array<i32>} : memref<32x1152xbf16, #tpu.memory_space<vmem>>, vector<32x128xbf16>,
    %c1_i32_89 = arith.constant 1 : i32
    %91 = arith.addi %0, %c1_i32_89 : i32
    %c1_i32_90 = arith.constant 1 : i32
    %92 = arith.addi %91, %c1_i32_90 : i32
    %c0_91 = arith.constant 0 : index
    %93 = arith.index_cast %92 : i32 to index
    %c1_92 = arith.constant 1 : index
    %c0_93 = arith.constant 0 : index
    %94 = vector.load %arg2[%c0_91, %93, %c1_92, %c0_93] : memref<1x34x34x128xbf16, #tpu.memory_space<vmem>>, vector<1x1x32x128xbf16>
    %95 = vector.shape_cast %94 : vector<1x1x32x128xbf16> to vector<32x128xbf16>
    %c0_94 = arith.constant 0 : index
    %c512_95 = arith.constant 512 : index
    %96 = vector.load %arg7[%c0_94, %c512_95] : memref<32x1152xbf16, #tpu.memory_space<vmem>>, vector<32x128xbf16>
    tpu.vector_store %arg7[%c0_94, %c512_95], %95 {strides = array<i32>} : memref<32x1152xbf16, #tpu.memory_space<vmem>>, vector<32x128xbf16>,
    %c1_i32_96 = arith.constant 1 : i32
    %97 = arith.addi %0, %c1_i32_96 : i32
    %c1_i32_97 = arith.constant 1 : i32
    %98 = arith.addi %97, %c1_i32_97 : i32
    %c0_98 = arith.constant 0 : index
    %99 = arith.index_cast %98 : i32 to index
    %c2_99 = arith.constant 2 : index
    %c0_100 = arith.constant 0 : index
    %100 = vector.load %arg2[%c0_98, %99, %c2_99, %c0_100] : memref<1x34x34x128xbf16, #tpu.memory_space<vmem>>, vector<1x1x32x128xbf16>
    %101 = vector.shape_cast %100 : vector<1x1x32x128xbf16> to vector<32x128xbf16>
    %c0_101 = arith.constant 0 : index
    %c640_102 = arith.constant 640 : index
    %102 = vector.load %arg7[%c0_101, %c640_102] : memref<32x1152xbf16, #tpu.memory_space<vmem>>, vector<32x128xbf16>
    tpu.vector_store %arg7[%c0_101, %c640_102], %101 {strides = array<i32>} : memref<32x1152xbf16, #tpu.memory_space<vmem>>, vector<32x128xbf16>,
    %c1_i32_103 = arith.constant 1 : i32
    %103 = arith.addi %0, %c1_i32_103 : i32
    %c2_i32_104 = arith.constant 2 : i32
    %104 = arith.addi %103, %c2_i32_104 : i32
    %c0_105 = arith.constant 0 : index
    %105 = arith.index_cast %104 : i32 to index
    %c0_106 = arith.constant 0 : index
    %c0_107 = arith.constant 0 : index
    %106 = vector.load %arg2[%c0_105, %105, %c0_106, %c0_107] : memref<1x34x34x128xbf16, #tpu.memory_space<vmem>>, vector<1x1x32x128xbf16>
    %107 = vector.shape_cast %106 : vector<1x1x32x128xbf16> to vector<32x128xbf16>
    %c0_108 = arith.constant 0 : index
    %c768_109 = arith.constant 768 : index
    %108 = vector.load %arg7[%c0_108, %c768_109] : memref<32x1152xbf16, #tpu.memory_space<vmem>>, vector<32x128xbf16>
    tpu.vector_store %arg7[%c0_108, %c768_109], %107 {strides = array<i32>} : memref<32x1152xbf16, #tpu.memory_space<vmem>>, vector<32x128xbf16>,
    %c1_i32_110 = arith.constant 1 : i32
    %109 = arith.addi %0, %c1_i32_110 : i32
    %c2_i32_111 = arith.constant 2 : i32
    %110 = arith.addi %109, %c2_i32_111 : i32
    %c0_112 = arith.constant 0 : index
    %111 = arith.index_cast %110 : i32 to index
    %c1_113 = arith.constant 1 : index
    %c0_114 = arith.constant 0 : index
    %112 = vector.load %arg2[%c0_112, %111, %c1_113, %c0_114] : memref<1x34x34x128xbf16, #tpu.memory_space<vmem>>, vector<1x1x32x128xbf16>
    %113 = vector.shape_cast %112 : vector<1x1x32x128xbf16> to vector<32x128xbf16>
    %c0_115 = arith.constant 0 : index
    %c896_116 = arith.constant 896 : index
    %114 = vector.load %arg7[%c0_115, %c896_116] : memref<32x1152xbf16, #tpu.memory_space<vmem>>, vector<32x128xbf16>
    tpu.vector_store %arg7[%c0_115, %c896_116], %113 {strides = array<i32>} : memref<32x1152xbf16, #tpu.memory_space<vmem>>, vector<32x128xbf16>,
    %c1_i32_117 = arith.constant 1 : i32
    %115 = arith.addi %0, %c1_i32_117 : i32
    %c2_i32_118 = arith.constant 2 : i32
    %116 = arith.addi %115, %c2_i32_118 : i32
    %c0_119 = arith.constant 0 : index
    %117 = arith.index_cast %116 : i32 to index
    %c2_120 = arith.constant 2 : index
    %c0_121 = arith.constant 0 : index
    %118 = vector.load %arg2[%c0_119, %117, %c2_120, %c0_121] : memref<1x34x34x128xbf16, #tpu.memory_space<vmem>>, vector<1x1x32x128xbf16>
    %119 = vector.shape_cast %118 : vector<1x1x32x128xbf16> to vector<32x128xbf16>
    %c0_122 = arith.constant 0 : index
    %c1024_123 = arith.constant 1024 : index
    %120 = vector.load %arg7[%c0_122, %c1024_123] : memref<32x1152xbf16, #tpu.memory_space<vmem>>, vector<32x128xbf16>
    tpu.vector_store %arg7[%c0_122, %c1024_123], %119 {strides = array<i32>} : memref<32x1152xbf16, #tpu.memory_space<vmem>>, vector<32x128xbf16>,
    %c0_124 = arith.constant 0 : index
    %c0_125 = arith.constant 0 : index
    %121 = vector.load %arg7[%c0_124, %c0_125] : memref<32x1152xbf16, #tpu.memory_space<vmem>>, vector<32x1152xbf16>
    %c0_126 = arith.constant 0 : index
    %c0_127 = arith.constant 0 : index
    %122 = vector.load %arg3[%c0_126, %c0_127] : memref<1152x128xbf16, #tpu.memory_space<vmem>>, vector<1152x128xbf16>
    %cst_128 = arith.constant dense<0.000000e+00> : vector<32x128xf32>
    %123 = tpu.matmul %121, %122, %cst_128 {dimension_numbers = #tpu.dot_dimension_numbers<[1], [0], [0], [1], [0, 0, 1, 1], [], []>} : vector<32x1152xbf16>, vector<1152x128xbf16>, vector<32x128xf32> -> vector<32x128xf32>
    %c0_129 = arith.constant 0 : index
    %c0_130 = arith.constant 0 : index
    %124 = vector.load %arg4[%c0_129, %c0_130] : memref<1x128xf32, #tpu.memory_space<vmem>>, vector<1x128xf32>
    %125 = vector.broadcast %124 : vector<1x128xf32> to vector<32x128xf32>
    %126 = arith.mulf %123, %125 : vector<32x128xf32>
    %c0_131 = arith.constant 0 : index
    %c0_132 = arith.constant 0 : index
    %127 = vector.load %arg5[%c0_131, %c0_132] : memref<1x128xf32, #tpu.memory_space<vmem>>, vector<1x128xf32>
    %128 = vector.broadcast %127 : vector<1x128xf32> to vector<32x128xf32>
    %129 = arith.addf %126, %128 : vector<32x128xf32>
    %cst_133 = arith.constant 0.000000e+00 : f32
    %130 = vector.broadcast %cst_133 : f32 to vector<32x128xf32>
    %131 = arith.maximumf %129, %130 : vector<32x128xf32>
    %c0_134 = arith.constant 0 : index
    %c0_135 = arith.constant 0 : index
    %132 = vector.load %arg8[%c0_134, %c0_135] : memref<32x128xf32, #tpu.memory_space<vmem>>, vector<32x128xf32>
    %133 = arith.maximumf %132, %131 : vector<32x128xf32>
    %c0_136 = arith.constant 0 : index
    %c0_137 = arith.constant 0 : index
    %134 = vector.load %arg8[%c0_136, %c0_137] : memref<32x128xf32, #tpu.memory_space<vmem>>, vector<32x128xf32>
    tpu.vector_store %arg8[%c0_136, %c0_137], %133 {strides = array<i32>} : memref<32x128xf32, #tpu.memory_space<vmem>>, vector<32x128xf32>,
    %c0_138 = arith.constant 0 : index
    %c0_139 = arith.constant 0 : index
    %135 = tpu.strided_load %arg8[%c0_138, %c0_139] {strides = array<i32: 2, 1>} : memref<32x128xf32, #tpu.memory_space<vmem>>, vector<16x128xf32>
    %c1_140 = arith.constant 1 : index
    %c0_141 = arith.constant 0 : index
    %136 = tpu.strided_load %arg8[%c1_140, %c0_141] {strides = array<i32: 2, 1>} : memref<32x128xf32, #tpu.memory_space<vmem>>, vector<16x128xf32>
    %137 = arith.maximumf %135, %136 : vector<16x128xf32>
    %138 = arith.truncf %137 : vector<16x128xf32> to vector<16x128xbf16>
    %c0_142 = arith.constant 0 : index
    %c0_143 = arith.constant 0 : index
    %c0_144 = arith.constant 0 : index
    %c0_145 = arith.constant 0 : index
    %139 = vector.load %arg6[%c0_142, %c0_143, %c0_144, %c0_145] : memref<1x1x16x128xbf16, #tpu.memory_space<vmem>>, vector<1x1x16x128xbf16>
    %140 = vector.shape_cast %139 : vector<1x1x16x128xbf16> to vector<16x128xbf16>
    %141 = vector.shape_cast %138 : vector<16x128xbf16> to vector<1x1x16x128xbf16>
    tpu.vector_store %arg6[%c0_142, %c0_143, %c0_144, %c0_145], %141 {strides = array<i32>} : memref<1x1x16x128xbf16, #tpu.memory_space<vmem>>, vector<1x1x16x128xbf16>,
    return
  }
  func.func @transform_0(%arg0: i32, %arg1: i32) -> (i32, i32, i32, i32) {
    %c0_i32 = arith.constant 0 : i32
    %c0_i32_0 = arith.constant 0 : i32
    %c0_i32_1 = arith.constant 0 : i32
    %c0_i32_2 = arith.constant 0 : i32
    return %arg0, %c0_i32, %c0_i32_0, %c0_i32_1 : i32, i32, i32, i32
  }
  func.func @transform_1(%arg0: i32, %arg1: i32) -> (i32, i32) {
    %c0_i32 = arith.constant 0 : i32
    %c0_i32_0 = arith.constant 0 : i32
    %c0_i32_1 = arith.constant 0 : i32
    return %c0_i32, %c0_i32_0 : i32, i32
  }
  func.func @transform_2(%arg0: i32, %arg1: i32) -> (i32, i32) {
    %c0_i32 = arith.constant 0 : i32
    %c0_i32_0 = arith.constant 0 : i32
    %c0_i32_1 = arith.constant 0 : i32
    return %c0_i32, %c0_i32_0 : i32, i32
  }
  func.func @transform_3(%arg0: i32, %arg1: i32) -> (i32, i32) {
    %c0_i32 = arith.constant 0 : i32
    %c0_i32_0 = arith.constant 0 : i32
    %c0_i32_1 = arith.constant 0 : i32
    return %c0_i32, %c0_i32_0 : i32, i32
  }
  func.func @transform_4(%arg0: i32, %arg1: i32) -> (i32, i32, i32, i32) {
    %c0_i32 = arith.constant 0 : i32
    %c0_i32_0 = arith.constant 0 : i32
    %c0_i32_1 = arith.constant 0 : i32
    return %arg0, %arg1, %c0_i32, %c0_i32_0 : i32, i32, i32, i32
  }
}

</mosaic_0001>

<bundles_post_ra>
// kernel: tpu_custom_call.1
= control target key start
LH: loop header
LB: loop body
LE: loop exit
PB: predicated region body
PF: predicated region fallthrough
CT: control target
= control target key end

     0   :  { %9 = vsyncpa [#allocation5], 0  ;;  %s4262_s0 = inlined_call_operand.vmem [shape: bf16[2,34,34,128], index: 0, kind: input, shape index: {}]   ;;  %s4263_s1 = inlined_call_operand.vmem [shape: bf16[1152,128], index: 1, kind: input, shape index: {}]   ;;  %s4264_s2 = inlined_call_operand.vmem [shape: f32[1,128], index: 2, kind: input, shape index: {}]   ;;  %s4265_s3 = inlined_call_operand.vmem [shape: f32[1,128], index: 3, kind: input, shape index: {}]   ;;  %s4266_s4 = inlined_call_operand.hbm [shape: bf16[2,16,16,128], index: 4, kind: output, shape index: {}]  }
   0x1   :  { %11 = vsyncpa [#allocation5 + $0x1], 0  ;;  %s3594_s15 = smov 0   ;;  %s3596_s16 = smov 0  }
   0x2   :  { %s3598_s17 = smov 0   ;;  %s3600_s18 = smov 0  }
   0x3   :  { %s3602_s19 = smov 0   ;;  %s3604_s20 = smov 0  }
   0x4   :  { %s3606_s21 = smov 0   ;;  %s3608_s22 = smov 0  }
   0x5 LB: > { %s2622_s23 = sadd.s32 4294967295, %s3564_s22   ;;  %s2623_s24 = sadd.s32 4294967294, %s3564_s22   ;;  %s3564_s22 = sphi %s3608_s22, %s17_s22   ;;  %s3560_s21 = sphi %s3606_s21, %s4275_s21   ;;  %s3556_s20 = sphi %s3604_s20, %s4274_s20   ;;  %s3552_s19 = sphi %s3602_s19, %s4273_s19   ;;  %s3548_s18 = sphi %s3600_s18, %s4272_s18   ;;  %s3544_s17 = sphi %s3598_s17, %s4271_s17   ;;  %s3540_s16 = sphi %s3596_s16, %s4270_s16   ;;  %s3536_s15 = sphi %s3594_s15, %s4269_s15  }
   0x6   : > { %s26_s25 = sadd.s32 1, %s3556_s20  ;;  %s29_s26 = sadd.s32 1, %s3560_s21 }
   0x7   : > { %p27_p0 = scmp.ge.s32.totalorder %s26_s25, 16  ;;  %p137_p1 = scmp.ne.s32.totalorder %s3544_s17, %s3540_s16 }
   0x8   : > { %p138_p2 = scmp.eq.s32.totalorder %s2622_s23, 31  ;;  %p143_p5 = scmp.ne.s32.totalorder %s3540_s16, %s3536_s15 }
   0x9   : > { %s4277_s25 = smov (%p27_p0, %s26_s25), 0  ;;  %s4279_s26 = smov (!%p27_p0, %s29_s26), %s3560_s21 }
   0xa   : > { %s123_s27 = ssub.s32 %s3556_s20, %s4277_s25  ;;  %p3645_p3 = por %p138_p2, %p137_p1 }
   0xb   : > { %p31_p4 = scmp.ge.s32.totalorder %s4279_s26, 2  ;;  %p144_p6 = scmp.eq.s32.totalorder %s2623_s24, 31 }
   0xc   : > { %p2626_p7 = scmp.ge.s32.totalorder %s3564_s22, 1  ;;  %p179_p9 = scmp.lt.s32.totalorder %s3564_s22, 33 }
   0xd   : > { %s4281_s26 = smov (%p31_p4, %s4279_s26), 0  ;;  %p3654_p8 = por %p144_p6, %p143_p5 }
   0xe   : > { %s122_s30 = ssub.s32 %s3560_s21, %s4281_s26  ;;  %s127_s5 = sadd.s32 1, %s3544_s17 }
   0xf   : > { %s124_s6 = sor.u32 %s123_s27, %s122_s30  ;;  %p180_p10 = pnand %p2626_p7, %p179_p9 }
  0x10   : > { %p125_p11 = scmp.eq.s32.totalorder %s124_s6, 0  ;;  %v3278_v0 = vld [vmem:[%s4263_s1 + $0x40] sm:$0xff] (!%p180_p10)   ;;  %v3282_v4 = vld [vmem:[%s4263_s1 + $0x48] sm:$0xff] (!%p180_p10)   ;;  %v3286_v8 = vld [vmem:[%s4263_s1 + $0x50] sm:$0xff] (!%p180_p10)   ;;  %p205_p12 = scmp.lt.s32.totalorder (!%p180_p10), %s3552_s19, 1  ;;  %vm294_vm1 = vcmask (!%p180_p10), 1046528  }
  0x11   : > { %183 = sbr.rel (%p180_p10) target bundleno = 443 (0x1bb), region = 36  ;;  %v3279_v1 = vld [vmem:[%s4263_s1 + $0xc0] sm:$0xff] (!%p180_p10)   ;;  %2920 = vmatprep.subr.bf16.mxu0 (!%p180_p10), %v3278_v0  ;;  %v3283_v5 = vld [vmem:[%s4263_s1 + $0xc8] sm:$0xff] (!%p180_p10)   ;;  %v3287_v9 = vld [vmem:[%s4263_s1 + $0xd0] sm:$0xff] (!%p180_p10)   ;;  %vm251_vm0 = vsmask.f32 (!%p180_p10), 7424 }
  0x12   : > { %s3663_s7 = scalar_select %p125_p11, %s3544_s17, %s127_s5  }
  0x13   : > { %v3280_v2 = vld [vmem:[%s4263_s1] sm:$0xff] (!%p180_p10)   ;;  %2948 = vmatprep.subr.bf16.mxu1 (!%p180_p10), %v3279_v1  ;;  %v3284_v6 = vld [vmem:[%s4263_s1 + $0x8] sm:$0xff] (!%p180_p10)   ;;  %v3288_v10 = vld [vmem:[%s4263_s1 + $0x10] sm:$0xff] (!%p180_p10)   ;;  %s2912_s13 = smul.u32 (!%p180_p10), 40, %s3548_s18  ;;  %s202_s23 = sand.u32 (!%p180_p10), 1, %s3540_s16  }
  0x14   : > { %v3281_v3 = vld [vmem:[%s4263_s1 + $0x80] sm:$0xff] (!%p180_p10)   ;;  %2921 = vmatpush3.bf16.msra.mxu0 (!%p180_p10), %v3280_v2  ;;  %v3285_v7 = vld [vmem:[%s4263_s1 + $0x88] sm:$0xff] (!%p180_p10)   ;;  %v3289_v11 = vld [vmem:[%s4263_s1 + $0x90] sm:$0xff] (!%p180_p10)   ;;  %s2908_s24 = sshll.u32 (!%p180_p10), %s3552_s19, 5  ;;  %s3566_s12 = smov (!%p180_p10), [#allocation4]  }
  0x15   : > { %2949 = vmatpush3.bf16.msra.mxu1 (!%p180_p10), %v3281_v3  ;;  %2922 = vmatprep.subr.bf16.mxu0 (!%p180_p10), %v3282_v4  ;;  %v3290_v12 = vld [vmem:[%s4263_s1 + $0x58] sm:$0xff] (!%p180_p10)   ;;  %v3294_v16 = vld [vmem:[%s4263_s1 + $0x60] sm:$0xff] (!%p180_p10)   ;;  %v3298_v20 = vld [vmem:[%s4263_s1 + $0x68] sm:$0xff] (!%p180_p10)  }
  0x16   : > { %2950 = vmatprep.subr.bf16.mxu1 (!%p180_p10), %v3283_v5  ;;  %v3291_v13 = vld [vmem:[%s4263_s1 + $0xd8] sm:$0xff] (!%p180_p10)   ;;  %v3295_v17 = vld [vmem:[%s4263_s1 + $0xe0] sm:$0xff] (!%p180_p10)   ;;  %v3299_v21 = vld [vmem:[%s4263_s1 + $0xe8] sm:$0xff] (!%p180_p10)  }
  0x17   : > { %v3292_v14 = vld [vmem:[%s4263_s1 + $0x18] sm:$0xff] (!%p180_p10)   ;;  %v3296_v18 = vld [vmem:[%s4263_s1 + $0x20] sm:$0xff] (!%p180_p10)   ;;  %v3300_v22 = vld [vmem:[%s4263_s1 + $0x28] sm:$0xff] (!%p180_p10)  }
  0x18   : > { %2923 = vmatpush3.bf16.msra.mxu0 %v3284_v6  ;;  %v3293_v15 = vld [vmem:[%s4263_s1 + $0x98] sm:$0xff]   ;;  %v3297_v19 = vld [vmem:[%s4263_s1 + $0xa0] sm:$0xff]   ;;  %s206_s9 = scalar_select %p205_p12, %s3552_s19, 1  ;;  %v3301_v23 = vld [vmem:[%s4263_s1 + $0xa8] sm:$0xff]  }
  0x19   : > { %2951 = vmatpush3.bf16.msra.mxu1 %v3285_v7  ;;  %2924 = vmatprep.subr.bf16.mxu0 %v3286_v8  ;;  %v3302_v24 = vld [vmem:[%s4263_s1 + $0x70] sm:$0xff]   ;;  %v3306_v28 = vld [vmem:[%s4263_s1 + $0x78] sm:$0xff]   ;;  %v3316_v44 = vld [vmem:[%s4263_s1 + $0x140] sm:$0xff]  }
  0x1a   : > { %2952 = vmatprep.subr.bf16.mxu1 %v3287_v9  ;;  %s3204_s30 = smul.u32 680, %s206_s9  ;;  %v3303_v25 = vld [vmem:[%s4263_s1 + $0xf0] sm:$0xff]   ;;  %v3307_v29 = vld [vmem:[%s4263_s1 + $0xf8] sm:$0xff]   ;;  %v3317_v47 = vld [vmem:[%s4263_s1 + $0x100] sm:$0xff]   ;;  %s2907_s9 = sshll.u32 %s3548_s18, 1 }
  0x1b   : > { %v3304_v26 = vld [vmem:[%s4263_s1 + $0x30] sm:$0xff]   ;;  %v3308_v30 = vld [vmem:[%s4263_s1 + $0x38] sm:$0xff]   ;;  %v3318_v48 = vld [vmem:[%s4263_s1 + $0x1c0] sm:$0xff]   ;;  %s4210_s18 = scalar_lea.sflag [#allocation5], %s202_s23 }
  0x1c   : > { %2925 = vmatpush3.bf16.msra.mxu0 %v3288_v10  ;;  %v3305_v27 = vld [vmem:[%s4263_s1 + $0xb0] sm:$0xff]   ;;  %s209_s27 = scalar_lea.vmem %s4262_s0, %s3204_s30  ;;  %v3309_v31 = vld [vmem:[%s4263_s1 + $0xb8] sm:$0xff]   ;;  %v3319_v51 = vld [vmem:[%s4263_s1 + $0x180] sm:$0xff]   ;;  %s3474_s30 = sshll.u32 %s3566_s12, 4  ;;  %s3475_s30 = int_to_ptr.vmem [resolvable:$false] %s3474_s30 }
  0x1d   : > { %2953 = vmatpush3.bf16.msra.mxu1 %v3289_v11  ;;  %2926 = vmatprep.subr.bf16.mxu0 %v3290_v12  ;;  %s3764_s14 = scalar_lea.vmem %s209_s27, %s2912_s13  ;;  %v3320_v52 = vld [vmem:[%s4263_s1 + $0x148] sm:$0xff]   ;;  %v3324_v56 = vld [vmem:[%s4263_s1 + $0x150] sm:$0xff]   ;;  %v3328_v60 = vld [vmem:[%s4263_s1 + $0x158] sm:$0xff]   ;;  %s2627_s13 = sshll.u32 %s202_s23, 3 }
  0x1e   : > { %2954 = vmatprep.subr.bf16.mxu1 %v3291_v13  ;;  %v3310_v32 = vld [vmem:[%s3764_s14] sm:$0xff]   ;;  %v3771_v33 = vld [vmem:[%s3764_s14 + $0x8] sm:$0xff]   ;;  %v3312_v34 = vld [vmem:[%s3764_s14 + $0x14] sm:$0xff]   ;;  %s2529_s27 = sadd.s32 %s2908_s24, %s2907_s9  ;;  %s204_s6 = scalar_lea.vmem [#allocation4], %s2627_s13 }
  0x1f   : > { %v253_v35 = vshrl.u32 %v3310_v32, 16  ;;  %v255_v36 = vshll.u32 %v3310_v32, 16  ;;  %v260_v37 = vshll.u32 %v3771_v33, 16  ;;  %1161 = vmatprep.mubr.bf16.mxu1 %v3312_v34  ;;  %v3313_v40 = vld [vmem:[%s3764_s14] sm:$0xff]   ;;  %v3778_v42 = vld [vmem:[%s3764_s14 + $0x8] sm:$0xff]   ;;  %v3325_v57 = vld [vmem:[%s4263_s1 + $0x110] sm:$0xff]  }
  0x20   : > { %2927 = vmatpush3.bf16.msra.mxu0 %v3292_v14  ;;  %v3314_v41 = vld [vmem:[%s3764_s14] sm:$0xfe]   ;;  %v296_v46 = vrot.slane %v3778_v42, 1  ;;  %v3321_v53 = vld [vmem:[%s4263_s1 + $0x108] sm:$0xff]   ;;  %v3326_v58 = vld [vmem:[%s4263_s1 + $0x1d0] sm:$0xff]   ;;  %v264_v4 = vshrl.u32 %v3771_v33, 16 }
  0x21   : > { %2955 = vmatpush3.bf16.msra.mxu1 %v3293_v15  ;;  %2928 = vmatprep.subr.bf16.mxu0 %v3294_v16  ;;  %v257_v38 = vrot.slane %v255_v36, 1  ;;  %v262_v39 = vrot.slane %v260_v37, 1  ;;  %v295_v45 = vrot.slane %v3314_v41, 1  ;;  %v3322_v54 = vld [vmem:[%s4263_s1 + $0x1c8] sm:$0xff]   ;;  %v3327_v59 = vld [vmem:[%s4263_s1 + $0x190] sm:$0xff]   ;;  %v3329_v61 = vld [vmem:[%s4263_s1 + $0x118] sm:$0xff]  }
  0x22   : > { %2956 = vmatprep.subr.bf16.mxu1 %v3295_v17  ;;  %v3323_v55 = vld [vmem:[%s4263_s1 + $0x188] sm:$0xff]   ;;  %v3330_v62 = vld [vmem:[%s4263_s1 + $0x1d8] sm:$0xff]   ;;  %v3332_v0 = vld [vmem:[%s4263_s1 + $0x160] sm:$0xff]   ;;  %s2909_s5 = sshll.u32 %s2529_s27, 6  ;;  %s2532_s8 = sshll.u32 %s204_s6, 4  ;;  %s4208_s8 = int_to_ptr.vmem [resolvable:$true] %s2532_s8 }
  0x23   : > { %v258_v43 = vor.u32 %v257_v38, %v253_v35  ;;  %v297_v50 = vsel %vm294_vm1, %v295_v45, %v296_v46  ;;  %v3331_v63 = vld [vmem:[%s4263_s1 + $0x198] sm:$0xff]   ;;  %v3333_v1 = vld [vmem:[%s4263_s1 + $0x120] sm:$0xff]   ;;  %v3336_v5 = vld [vmem:[%s4263_s1 + $0x168] sm:$0xff]   ;;  %v266_v8 = vor.u32 %v264_v4, %v262_v39  ;;  %s4206_s11 = scalar_lea.hbm %s4266_s4, %s2909_s5  ;;  %s3470_s19 = scalar_lea.vmem %s4208_s8, 128 }
  0x24   : > { %2929 = vmatpush3.bf16.msra.mxu0 %v3296_v18  ;;  %v3334_v2 = vld [vmem:[%s4263_s1 + $0x1e0] sm:$0xff]   ;;  %v3337_v6 = vld [vmem:[%s3764_s14 + $0x10] ss:$0 sps:$4 sm:$0x11]   ;;  %v3339_v10 = vld [vmem:[%s4263_s1 + $0x128] sm:$0xff]   ;;  %p3471_p13 = scmp.ne.s32.totalorder %s4208_s8, %s3470_s19  ;;  %s3476_s13 = scalar_lea.vmem %s3475_s30, 256 }
  0x25   : > { %2957 = vmatpush3.bf16.msra.mxu1 %v3297_v19  ;;  %2930 = vmatprep.subr.bf16.mxu0 %v3298_v20  ;;  %v263_v49 = vsel %vm251_vm0, %v258_v43, %v262_v39  ;;  %v3335_v3 = vld [vmem:[%s4263_s1 + $0x1a0] sm:$0xff]   ;;  %v268_v9 = vshll.u32 %v3337_v6, 16  ;;  %v3340_v11 = vld [vmem:[%s3764_s14 + $0x8] sm:$0xff]   ;;  %v3341_v12 = vld [vmem:[%s3764_s14 + $0x10] ss:$0 sps:$4 sm:$0x11]   ;;  %p3477_p2 = scmp.lt.s32.totalorder %s4208_s8, %s3475_s30  ;;  %p3478_p4 = scmp.lt.s32.totalorder %s3476_s13, %s3470_s19 }
  0x26   : > { %2958 = vmatprep.subr.bf16.mxu1 %v3299_v21  ;;  %1112 = vmatprep.mubr.bf16.mxu0 %v263_v49  ;;  %v3338_v7 = vld [vmem:[%s3764_s14 + $0x1c] sm:$0xff]   ;;  %v3342_v14 = vld [vmem:[%s4263_s1 + $0x1e8] sm:$0xff]   ;;  %v298_v15 = vrot.slane %v3341_v12, 1  ;;  %v3344_v18 = vld [vmem:[%s4263_s1 + $0x170] sm:$0xff]   ;;  %p3472_p0 = pnand %p3471_p13, %p3645_p3 }
  0x27   : > { %v270_v13 = vrot.slane %v268_v9, 1  ;;  %v3343_v16 = vld [vmem:[%s4263_s1 + $0x1a8] sm:$0xff]   ;;  %v3345_v20 = vld [vmem:[%s4263_s1 + $0x130] sm:$0xff]   ;;  %v3355_v33 = vld [vmem:[%s3764_s14 + $0x1c] sm:$0xff]   ;;  %p3479_p5 = por %p3478_p4, %p3477_p2 }
  0x28   : > { %2931 = vmatpush3.bf16.msra.mxu0 %v3300_v22  ;;  %v299_v19 = vsel %vm294_vm1, %v296_v46, %v298_v15  ;;  %v3346_v21 = vld [vmem:[%s4263_s1 + $0x1f0] sm:$0xff]   ;;  %v3356_v36 = vld [vmem:[%s4263_s1 + $0x200] sm:$0xff]   ;;  %v3357_v37 = vld [vmem:[%s3764_s14 + $0x28] sm:$0xff]   ;;  %v352_v38 = vshll.u32 %v3355_v33, 16  ;;  %p3473_p1 = pneg %p3472_p0 }
  0x29   : > { %2959 = vmatpush3.bf16.msra.mxu1 %v3301_v23  ;;  %2932 = vmatprep.subr.bf16.mxu0 %v3302_v24  ;;  %v271_v17 = vsel %vm251_vm0, %v266_v8, %v270_v13  ;;  %v3347_v22 = vld [vmem:[%s4263_s1 + $0x1b0] sm:$0xff]   ;;  %v3348_v23 = vld [vmem:[%s4263_s1 + $0x178] sm:$0xff]   ;;  %v436_v41 = vshrl.u32 %v3357_v37, 16  ;;  %v438_v42 = vshll.u32 %v3357_v37, 16  ;;  %v3375_v15 = vld [vmem:[%s4263_s1 + $0x220] sm:$0xff]  }
  0x2a   : > { %2960 = vmatprep.subr.bf16.mxu1 %v3303_v25  ;;  %v3349_v24 = vld [vmem:[%s4263_s1 + $0x138] sm:$0xff]   ;;  %v3358_v39 = vld [vmem:[%s3764_s14 + $0x30] sm:$0xff]   ;;  %v354_v43 = vrot.slane %v352_v38, 1  ;;  %p3480_p6 = pnand %p3479_p5, %p3473_p1 }
  0x2b   : > { %v3350_v25 = vld [vmem:[%s4263_s1 + $0x1f8] sm:$0xff]   ;;  %v440_v46 = vrot.slane %v438_v42, 1  ;;  %v3369_v6 = vld [vmem:[%s3764_s14 + $0x30] sm:$0xff]  }
  0x2c   : > { %2933 = vmatpush3.bf16.msra.mxu0 %v3304_v26  ;;  %v3351_v26 = vld [vmem:[%s3764_s14 + $0x14] sm:$0xfe]   ;;  %v3393_v38 = vld [vmem:[%s3764_s14 + $0x1c] sm:$0xff]  }
  0x2d   : > { %2961 = vmatpush3.bf16.msra.mxu1 %v3305_v27  ;;  %2934 = vmatprep.subr.bf16.mxu0 %v3306_v28  ;;  %v3352_v27 = vld [vmem:[%s3764_s14 + $0x1c] sm:$0xff]   ;;  %v3371_v8 = vld [vmem:[%s4263_s1 + $0x10] sm:$0xff]   ;;  %v1399_v42 = vshll.u32 %v3393_v38, 16 }
  0x2e   : > { %2962 = vmatprep.subr.bf16.mxu1 %v3307_v29  ;;  %v3353_v28 = vld [vmem:[%s4263_s1 + $0x1b8] sm:$0xff]   ;;  %v386_v29 = vrot.slane %v3351_v26, 1  ;;  %v3387_v26 = vld [vmem:[%s3764_s14 + $0x30] sm:$0xff]  }
  0x2f   : > { %v3373_v12 = vld [vmem:[%s4263_s1 + $0x58] sm:$0xff]  }
  0x30   : > { %2935 = vmatpush3.bf16.msra.mxu0 %v3308_v30  ;;  %v387_v30 = vrot.slane %v3352_v27, 1  ;;  %v3385_v27 = vld [vmem:[%s4263_s1 + $0x78] sm:$0xff]  }
  0x31   : > { %2963 = vmatpush3.bf16.msra.mxu1 %v3309_v31  ;;  %2976 = vmatprep.subr.bf16.mxu0 %v3316_v44  ;;  %v3354_v31 = vld [vmem:[%s3764_s14 + $0x14] sm:$0xff]   ;;  %v443_v44 = vshll.u32 %v3358_v39, 16 }
  0x32   : > { %3004 = vmatprep.subr.bf16.mxu1 %v3318_v48  ;;  %v388_v32 = vsel %vm294_vm1, %v386_v29, %v387_v30  ;;  %v345_v34 = vshrl.u32 %v3354_v31, 16  ;;  %v347_v35 = vshll.u32 %v3354_v31, 16  ;;  %v3360_v48 = vld [vmem:[%s4263_s1 + $0x40] sm:$0xff]   ;;  %v478_v29 = vrot.slane %v3387_v26, 1  ;;  %v3392_v37 = vld [vmem:[%s3764_s14 + $0x14] sm:$0xff]  }
  0x33   : > { %1113 = vmatmul.mubr.bf16.vlgmr.msra.gmra.mrb[0].mxu0 %v3313_v40  ;;  %v445_v49 = vrot.slane %v443_v44, 1  ;;  %v3389_v31 = vld [vmem:[%s3764_s14 + $0x38] ss:$0 sps:$4 sm:$0x11]   ;;  %v1401_v44 = vrot.slane %v1399_v42, 1  ;;  %v3439_v42 = vld [vmem:[%s3764_s14 + $0x30] sm:$0xff]  }
  0x34   : > { %1162 = vmatmul.mubr.bf16.vlgmr.msra.gmra.mrb[0].mxu1 %v297_v50  ;;  %2977 = vmatpush3.bf16.msra.mxu0 %v3317_v47  ;;  %v349_v40 = vrot.slane %v347_v35, 1  ;;  %v3359_v47 = vld [vmem:[%s3764_s14 + $0x28] sm:$0xff]   ;;  %v3361_v50 = vld [vmem:[%s4263_s1] sm:$0xff]  }
  0x35   : > { %3005 = vmatpush3.bf16.msra.mxu1 %v3319_v51  ;;  %2978 = vmatprep.subr.bf16.mxu0 %v3320_v52  ;;  %v441_v52 = vor.u32 %v440_v46, %v436_v41  ;;  %v3391_v35 = vld [vmem:[%s4263_s1 + $0x80] sm:$0xff]   ;;  %v1394_v41 = vshll.u32 %v3392_v37, 16  ;;  %v3397_v46 = vld [vmem:[%s4263_s1 + $0xc8] sm:$0xff]  }
  0x36   : > { %3006 = vmatprep.subr.bf16.mxu1 %v3322_v54  ;;  %1169 = vmatprep.mubr.bf16.mxu1 %v3338_v7  ;;  %v350_v45 = vor.u32 %v349_v40, %v345_v34  ;;  %v3363_v54 = vld [vmem:[%s4263_s1 + $0x48] sm:$0xff]   ;;  %v3370_v7 = vld [vmem:[%s4263_s1 + $0x50] sm:$0xff]   ;;  %v480_v34 = vrot.slane %v3389_v31, 1  ;;  %v1392_v40 = vshrl.u32 %v3392_v37, 16 }
  0x37   : > { %1120 = vmatprep.mubr.bf16.mxu0 %v271_v17  ;;  %v3378_v17 = vld [vmem:[%s4263_s1 + $0x228] sm:$0xff]  }
  0x38   : > { %2979 = vmatpush3.bf16.msra.mxu0 %v3321_v53  ;;  %v355_v51 = vsel %vm251_vm0, %v350_v45, %v354_v43  ;;  %v3362_v53 = vld [vmem:[%s4263_s1 + $0x208] sm:$0xff]   ;;  %v3395_v45 = vld [vmem:[%s3764_s14 + $0x14] sm:$0xff]  }
  0x39   : > { %3007 = vmatpush3.bf16.msra.mxu1 %v3323_v55  ;;  %2980 = vmatprep.subr.bf16.mxu0 %v3324_v56  ;;  %v356_v55 = vshrl.u32 %v3355_v33, 16  ;;  %v446_v56 = vsel %vm251_vm0, %v441_v52, %v445_v49  ;;  %v3401_v52 = vld [vmem:[%s4263_s1 + $0xd0] sm:$0xff]   ;;  %v3431_v26 = vld [vmem:[%s3764_s14 + $0x28] sm:$0xfe]  }
  0x3a   : > { %3008 = vmatprep.subr.bf16.mxu1 %v3326_v58  ;;  %v447_v58 = vshrl.u32 %v3358_v39, 16  ;;  %v3394_v39 = vld [vmem:[%s4263_s1 + $0x140] sm:$0xff]   ;;  %v3436_v37 = vld [vmem:[%s4263_s1 + $0x1c8] sm:$0xff]  }
  0x3b   : > { %1121 = vmatmul.mubr.bf16.gmra.mrb[4].mxu0 %v3340_v11  ;;  %v3372_v11 = vld [vmem:[%s4263_s1 + $0x218] sm:$0xff]  }
  0x3c   : > { %2981 = vmatpush3.bf16.msra.mxu0 %v3325_v57  ;;  %1170 = vmatmul.mubr.bf16.gmra.mrb[4].mxu1 %v299_v19  ;;  %v3364_v57 = vld [vmem:[%s3764_s14 + $0x24] ss:$0 sps:$4 sm:$0x11]   ;;  %v449_v4 = vor.u32 %v447_v58, %v445_v49  ;;  %v3379_v19 = vld [vmem:[%s4263_s1 + $0x68] sm:$0xff]   ;;  %v3404_v58 = vld [vmem:[%s4263_s1 + $0x110] sm:$0xff]  }
  0x3d   : > { %3009 = vmatpush3.bf16.msra.mxu1 %v3327_v59  ;;  %2982 = vmatprep.subr.bf16.mxu0 %v3328_v60  ;;  %v3365_v59 = vld [vmem:[%s4263_s1 + $0x8] sm:$0xff]   ;;  %v389_v60 = vrot.slane %v3364_v57, 1  ;;  %v3396_v49 = vld [vmem:[%s4263_s1 + $0x100] sm:$0xff]   ;;  %v3406_v57 = vld [vmem:[%s4263_s1 + $0x98] sm:$0xff]  }
  0x3e   : > { %3010 = vmatprep.subr.bf16.mxu1 %v3330_v62  ;;  %1210 = vmatprep.mubr.bf16.mxu0 %v388_v32  ;;  %v3367_v62 = vld [vmem:[%s4263_s1 + $0x210] sm:$0xff]   ;;  %v3390_v32 = vld [vmem:[%s4263_s1 + $0xc0] sm:$0xff]  }
  0x3f   : > { %1259 = vmatprep.mubr.bf16.mxu1 %v446_v56  ;;  %v3405_v56 = vld [vmem:[%s4263_s1 + $0xd8] sm:$0xff]  }
  0x40   : > { %2983 = vmatpush3.bf16.msra.mxu0 %v3329_v61  ;;  %v3366_v61 = vld [vmem:[%s3764_s14 + $0x24] ss:$0 sps:$4 sm:$0x11]  }
  0x41   : > { %3011 = vmatpush3.bf16.msra.mxu1 %v3331_v63  ;;  %2984 = vmatprep.subr.bf16.mxu0 %v3332_v0  ;;  %v390_v63 = vsel %vm294_vm1, %v387_v30, %v389_v60  ;;  %v358_v0 = vor.u32 %v356_v55, %v354_v43  ;;  %v3388_v30 = vld [vmem:[%s4263_s1 + $0x38] sm:$0xff]   ;;  %v1396_v43 = vrot.slane %v1394_v41, 1  ;;  %v3403_v55 = vld [vmem:[%s4263_s1 + $0x150] sm:$0xff]   ;;  %v3409_v60 = vld [vmem:[%s4263_s1 + $0xe0] sm:$0xff]  }
  0x42   : > { %3012 = vmatprep.subr.bf16.mxu1 %v3334_v2  ;;  %v3368_v2 = vld [vmem:[%s3764_s14 + $0x38] ss:$0 sps:$4 sm:$0x11]  }
  0x44   : > { %2985 = vmatpush3.bf16.msra.mxu0 %v3333_v1  ;;  %v360_v1 = vshll.u32 %v3366_v61, 16  ;;  %v3410_v61 = vld [vmem:[%s4263_s1 + $0xa0] sm:$0xff]  }
  0x45   : > { %3013 = vmatpush3.bf16.msra.mxu1 %v3335_v3  ;;  %2986 = vmatprep.subr.bf16.mxu0 %v3336_v5  ;;  %v451_v5 = vshll.u32 %v3368_v2, 16  ;;  %v3412_v2 = vld [vmem:[%s4263_s1 + $0x120] sm:$0xff]  }
  0x46   : > { %3014 = vmatprep.subr.bf16.mxu1 %v3342_v14  ;;  %v362_v3 = vrot.slane %v360_v1, 1  ;;  %v3374_v14 = vld [vmem:[%s4263_s1 + $0x18] sm:$0xff]   ;;  %v3414_v1 = vld [vmem:[%s4263_s1 + $0xa8] sm:$0xff]  }
  0x48   : > { %2987 = vmatpush3.bf16.msra.mxu0 %v3339_v10  ;;  %v363_v9 = vsel %vm251_vm0, %v358_v0, %v362_v3  ;;  %v453_v10 = vrot.slane %v451_v5, 1  ;;  %v3413_v0 = vld [vmem:[%s4263_s1 + $0xe8] sm:$0xff]   ;;  %v1403_v3 = vshrl.u32 %v3393_v38, 16  ;;  %v3437_v38 = vld [vmem:[%s4263_s1 + $0x200] sm:$0xff]  }
  0x49   : > { %3015 = vmatpush3.bf16.msra.mxu1 %v3343_v16  ;;  %2988 = vmatprep.subr.bf16.mxu0 %v3344_v18  ;;  %v3376_v16 = vld [vmem:[%s4263_s1 + $0x60] sm:$0xff]   ;;  %v3416_v5 = vld [vmem:[%s4263_s1 + $0x128] sm:$0xff]  }
  0x4a   : > { %3016 = vmatprep.subr.bf16.mxu1 %v3346_v21  ;;  %v454_v13 = vsel %vm251_vm0, %v449_v4, %v453_v10  ;;  %v3377_v18 = vld [vmem:[%s4263_s1 + $0x20] sm:$0xff]   ;;  %v3380_v21 = vld [vmem:[%s4263_s1 + $0x28] sm:$0xff]  }
  0x4b   : > { %v3415_v4 = vld [vmem:[%s4263_s1 + $0x168] sm:$0xff]  }
  0x4c   : > { %2989 = vmatpush3.bf16.msra.mxu0 %v3345_v20  ;;  %v3381_v20 = vld [vmem:[%s4263_s1 + $0x230] sm:$0xff]  }
  0x4d   : > { %3017 = vmatpush3.bf16.msra.mxu1 %v3347_v22  ;;  %2990 = vmatprep.subr.bf16.mxu0 %v3348_v23  ;;  %v3382_v22 = vld [vmem:[%s4263_s1 + $0x70] sm:$0xff]  }
  0x4e   : > { %3018 = vmatprep.subr.bf16.mxu1 %v3350_v25  ;;  %v3383_v23 = vld [vmem:[%s4263_s1 + $0x30] sm:$0xff]   ;;  %v3386_v25 = vld [vmem:[%s3764_s14 + $0x28] sm:$0xfe]  }
  0x50   : > { %2991 = vmatpush3.bf16.msra.mxu0 %v3349_v24  ;;  %v3384_v24 = vld [vmem:[%s4263_s1 + $0x238] sm:$0xff]  }
  0x51   : > { %3019 = vmatpush3.bf16.msra.mxu1 %v3353_v28  ;;  %3164 = vmatprep.subr.bf16.mxu0 %v3356_v36  ;;  %v477_v28 = vrot.slane %v3386_v25, 1 }
  0x52   : > { %3042 = vmatprep.subr.bf16.mxu1 %v3360_v48  ;;  %v3398_v48 = vld [vmem:[%s4263_s1 + $0x88] sm:$0xff]  }
  0x53   : > { %1211 = vmatmul.mubr.bf16.vlgmr.msra.gmra.mrb[8].mxu0 %v355_v51  ;;  %v479_v33 = vsel %vm294_vm1, %v477_v28, %v478_v29  ;;  %v3399_v51 = vld [vmem:[%s4263_s1 + $0x148] sm:$0xff]   ;;  %v3432_v28 = vld [vmem:[%s3764_s14 + $0x30] sm:$0xff]  }
  0x54   : > { %3165 = vmatpush3.bf16.msra.mxu0 %v3356_v36  ;;  %1260 = vmatmul.mubr.bf16.vlgmr.msra.gmra.mrb[8].mxu1 %v3359_v47  ;;  %v481_v36 = vsel %vm294_vm1, %v478_v29, %v480_v34  ;;  %v1397_v47 = vor.u32 %v1396_v43, %v1392_v40  ;;  %v1520_v29 = vrot.slane %v3431_v26, 1  ;;  %v1521_v31 = vrot.slane %v3432_v28, 1  ;;  %v3438_v40 = vld [vmem:[%s4263_s1 + $0x188] sm:$0xff]  }
  0x55   : > { %3166 = vmatprep.subr.bf16.mxu0 %v3362_v53  ;;  %3043 = vmatpush3.bf16.msra.mxu1 %v3361_v50  ;;  %v3468_v28 = vld [vmem:[%s3764_s14 + $0x4c] ss:$0 sps:$4 sm:$0x11]  }
  0x56   : > { %3044 = vmatprep.subr.bf16.mxu1 %v3363_v54  ;;  %1218 = vmatprep.mubr.bf16.mxu0 %v390_v63  ;;  %v1402_v50 = vsel %vm251_vm0, %v1397_v47, %v1401_v44  ;;  %v3400_v54 = vld [vmem:[%s4263_s1 + $0x108] sm:$0xff]   ;;  %v3411_v63 = vld [vmem:[%s4263_s1 + $0x160] sm:$0xff]   ;;  %v1522_v34 = vsel %vm294_vm1, %v1520_v29, %v1521_v31 }
  0x57   : > { %1267 = vmatprep.mubr.bf16.mxu1 %v454_v13  ;;  %v3442_v47 = vld [vmem:[%s4263_s1 + $0x208] sm:$0xff]  }
  0x58   : > { %3167 = vmatpush3.bf16.msra.mxu0 %v3362_v53  ;;  %v3402_v53 = vld [vmem:[%s4263_s1 + $0x90] sm:$0xff]  }
  0x59   : > { %3168 = vmatprep.subr.bf16.mxu0 %v3367_v62  ;;  %3045 = vmatpush3.bf16.msra.mxu1 %v3365_v59  ;;  %v3407_v59 = vld [vmem:[%s4263_s1 + $0x158] sm:$0xff]  }
  0x5a   : > { %3046 = vmatprep.subr.bf16.mxu1 %v3370_v7  ;;  %v3418_v7 = vld [vmem:[%s3764_s14 + $0x24] ss:$0 sps:$4 sm:$0x11]  }
  0x5b   : > { %1219 = vmatmul.mubr.bf16.gmra.mrb[12].mxu0 %v363_v9  ;;  %v1405_v9 = vor.u32 %v1403_v3, %v1401_v44  ;;  %v1407_v10 = vshll.u32 %v3418_v7, 16  ;;  %v3441_v44 = vld [vmem:[%s4263_s1 + $0x1d0] sm:$0xff]   ;;  %v3452_v3 = vld [vmem:[%s4263_s1 + $0x1e8] sm:$0xff]  }
  0x5c   : > { %3169 = vmatpush3.bf16.msra.mxu0 %v3367_v62  ;;  %1268 = vmatmul.mubr.bf16.gmra.mrb[12].mxu1 %v3369_v6  ;;  %v3408_v62 = vld [vmem:[%s4263_s1 + $0x118] sm:$0xff]   ;;  %v3417_v6 = vld [vmem:[%s4263_s1 + $0xf0] sm:$0xff]   ;;  %v3456_v7 = vld [vmem:[%s4263_s1 + $0x228] sm:$0xff]  }
  0x5d   : > { %3170 = vmatprep.subr.bf16.mxu0 %v3372_v11  ;;  %3047 = vmatpush3.bf16.msra.mxu1 %v3371_v8  ;;  %v3419_v8 = vld [vmem:[%s4263_s1 + $0xb0] sm:$0xff]   ;;  %v1409_v13 = vrot.slane %v1407_v10, 1 }
  0x5e   : > { %3048 = vmatprep.subr.bf16.mxu1 %v3373_v12  ;;  %3180 = vmatprep.mubr.bf16.mxu0 %v479_v33  ;;  %v3421_v12 = vld [vmem:[%s4263_s1 + $0x170] sm:$0xff]  }
  0x5f   : > { %2246 = vmatprep.mubr.bf16.mxu1 %v1402_v50  ;;  %v3435_v33 = vld [vmem:[%s3764_s14 + $0x30] sm:$0xff]   ;;  %v3443_v50 = vld [vmem:[%s3764_s14 + $0x38] ss:$0 sps:$4 sm:$0x11]  }
  0x60   : > { %3171 = vmatpush3.bf16.msra.mxu0 %v3372_v11  ;;  %v3420_v11 = vld [vmem:[%s3764_s14 + $0x1c] sm:$0xff]   ;;  %v3459_v10 = vld [vmem:[%s4263_s1 + $0x230] sm:$0xff]  }
  0x61   : > { %3172 = vmatprep.subr.bf16.mxu0 %v3375_v15  ;;  %3049 = vmatpush3.bf16.msra.mxu1 %v3374_v14  ;;  %v3422_v14 = vld [vmem:[%s4263_s1 + $0x130] sm:$0xff]  }
  0x62   : > { %3050 = vmatprep.subr.bf16.mxu1 %v3376_v16  ;;  %v1410_v16 = vsel %vm251_vm0, %v1405_v9, %v1409_v13  ;;  %v3458_v9 = vld [vmem:[%s4263_s1 + $0x1f8] sm:$0xff]  }
  0x63   : > { %v3460_v13 = vld [vmem:[%s4263_s1 + $0x1b8] sm:$0xff]  }
  0x64   : > { %3173 = vmatpush3.bf16.msra.mxu0 %v3375_v15  ;;  %v3423_v15 = vld [vmem:[%s4263_s1 + $0xf8] sm:$0xff]  }
  0x65   : > { %3174 = vmatprep.subr.bf16.mxu0 %v3378_v17  ;;  %3051 = vmatpush3.bf16.msra.mxu1 %v3377_v18  ;;  %v3425_v18 = vld [vmem:[%s4263_s1 + $0x178] sm:$0xff]  }
  0x66   : > { %3052 = vmatprep.subr.bf16.mxu1 %v3379_v19  ;;  %v3426_v19 = vld [vmem:[%s3764_s14 + $0x28] sm:$0xff]  }
  0x68   : > { %3175 = vmatpush3.bf16.msra.mxu0 %v3378_v17  ;;  %v3424_v17 = vld [vmem:[%s4263_s1 + $0xb8] sm:$0xff]  }
  0x69   : > { %3176 = vmatprep.subr.bf16.mxu0 %v3381_v20  ;;  %3053 = vmatpush3.bf16.msra.mxu1 %v3380_v21  ;;  %v3428_v21 = vld [vmem:[%s3764_s14 + $0x14] sm:$0xfe]  }
  0x6a   : > { %3054 = vmatprep.subr.bf16.mxu1 %v3382_v22  ;;  %v3429_v22 = vld [vmem:[%s3764_s14 + $0x1c] sm:$0xff]  }
  0x6b   : > { %v1434_v25 = vrot.slane %v3429_v22, 1 }
  0x6c   : > { %3177 = vmatpush3.bf16.msra.mxu0 %v3381_v20  ;;  %v3427_v20 = vld [vmem:[%s4263_s1 + $0x138] sm:$0xff]  }
  0x6d   : > { %3178 = vmatprep.subr.bf16.mxu0 %v3384_v24  ;;  %3055 = vmatpush3.bf16.msra.mxu1 %v3383_v23  ;;  %v3430_v23 = vld [vmem:[%s4263_s1 + $0x1c0] sm:$0xff]  }
  0x6e   : > { %3056 = vmatprep.subr.bf16.mxu1 %v3385_v27 }
  0x70   : > { %3179 = vmatpush3.bf16.msra.mxu0 %v3384_v24  ;;  %v1433_v24 = vrot.slane %v3428_v21, 1  ;;  %v3466_v21 = vld [vmem:[%s3764_s14 + $0x44] sm:$0xff]  }
  0x71   : > { %3070 = vmatprep.subr.bf16.mxu0 %v3390_v32  ;;  %3057 = vmatpush3.bf16.msra.mxu1 %v3388_v30  ;;  %v3433_v30 = vld [vmem:[%s4263_s1 + $0x180] sm:$0xff]   ;;  %v3434_v32 = vld [vmem:[%s3764_s14 + $0x28] sm:$0xff]  }
  0x72   : > { %3098 = vmatprep.subr.bf16.mxu1 %v3394_v39  ;;  %v1435_v27 = vsel %vm294_vm1, %v1433_v24, %v1434_v25  ;;  %v1486_v39 = vshll.u32 %v3435_v33, 16  ;;  %v3463_v24 = vld [vmem:[%s3764_s14 + $0x3c] sm:$0xff]  }
  0x73   : > { %3181 = vmatmul.mubr.bf16.vlgmr.msra.gmra.mrb[16].mxu0 %v481_v36  ;;  %v1481_v36 = vshll.u32 %v3434_v32, 16 }
  0x74   : > { %3071 = vmatpush3.bf16.msra.mxu0 %v3391_v35  ;;  %2247 = vmatmul.mubr.bf16.vlgmr.msra.gmra.mrb[16].mxu1 %v3395_v45  ;;  %v1479_v35 = vshrl.u32 %v3434_v32, 16  ;;  %v1488_v43 = vrot.slane %v1486_v39, 1 }
  0x75   : > { %3072 = vmatprep.subr.bf16.mxu0 %v3397_v46  ;;  %3099 = vmatpush3.bf16.msra.mxu1 %v3396_v49  ;;  %v1483_v41 = vrot.slane %v1481_v36, 1  ;;  %v3440_v46 = vld [vmem:[%s3764_s14 + $0x24] ss:$0 sps:$4 sm:$0x11]  }
  0x76   : > { %3100 = vmatprep.subr.bf16.mxu1 %v3399_v51  ;;  %2254 = vmatprep.mubr.bf16.mxu1 %v1410_v16  ;;  %v1436_v49 = vrot.slane %v3440_v46, 1  ;;  %v3444_v51 = vld [vmem:[%s4263_s1 + $0x190] sm:$0xff]  }
  0x77   : > { %2295 = vmatprep.mubr.bf16.mxu0 %v3426_v19  ;;  %v1484_v45 = vor.u32 %v1483_v41, %v1479_v35 }
  0x78   : > { %3073 = vmatpush3.bf16.msra.mxu0 %v3398_v48 }
  0x79   : > { %3074 = vmatprep.subr.bf16.mxu0 %v3401_v52  ;;  %3101 = vmatpush3.bf16.msra.mxu1 %v3400_v54  ;;  %v1489_v48 = vsel %vm251_vm0, %v1484_v45, %v1488_v43  ;;  %v1490_v52 = vshrl.u32 %v3435_v33, 16  ;;  %v1523_v54 = vrot.slane %v3443_v50, 1  ;;  %v1585_v33 = vshll.u32 %v3468_v28, 16 }
  0x7a   : > { %3102 = vmatprep.subr.bf16.mxu1 %v3403_v55  ;;  %v3445_v55 = vld [vmem:[%s3764_s14 + $0x38] ss:$0 sps:$4 sm:$0x11]  }
  0x7b   : > { %v1587_v35 = vrot.slane %v1585_v33, 1 }
  0x7c   : > { %3075 = vmatpush3.bf16.msra.mxu0 %v3402_v53  ;;  %2255 = vmatmul.mubr.bf16.gmra.mrb[20].mxu1 %v3420_v11  ;;  %v1437_v53 = vsel %vm294_vm1, %v1434_v25, %v1436_v49  ;;  %v3461_v11 = vld [vmem:[%s3764_s14 + $0x3c] sm:$0xff]   ;;  %v3467_v25 = vld [vmem:[%s3764_s14 + $0x4c] ss:$0 sps:$4 sm:$0x11]  }
  0x7d   : > { %3076 = vmatprep.subr.bf16.mxu0 %v3405_v56  ;;  %3103 = vmatpush3.bf16.msra.mxu1 %v3404_v58  ;;  %v3446_v56 = vld [vmem:[%s4263_s1 + $0x1d8] sm:$0xff]   ;;  %v1492_v58 = vor.u32 %v1490_v52, %v1488_v43 }
  0x7e   : > { %3104 = vmatprep.subr.bf16.mxu1 %v3407_v59  ;;  %2344 = vmatprep.mubr.bf16.mxu1 %v1522_v34  ;;  %v1494_v59 = vshll.u32 %v3445_v55, 16 }
  0x80   : > { %3077 = vmatpush3.bf16.msra.mxu0 %v3406_v57  ;;  %v1524_v57 = vsel %vm294_vm1, %v1521_v31, %v1523_v54 }
  0x81   : > { %3078 = vmatprep.subr.bf16.mxu0 %v3409_v60  ;;  %3105 = vmatpush3.bf16.msra.mxu1 %v3408_v62  ;;  %v3447_v60 = vld [vmem:[%s4263_s1 + $0x210] sm:$0xff]   ;;  %v1496_v62 = vrot.slane %v1494_v59, 1 }
  0x82   : > { %3106 = vmatprep.subr.bf16.mxu1 %v3411_v63  ;;  %v3449_v63 = vld [vmem:[%s4263_s1 + $0x1e0] sm:$0xff]  }
  0x84   : > { %3079 = vmatpush3.bf16.msra.mxu0 %v3410_v61  ;;  %v3448_v61 = vld [vmem:[%s4263_s1 + $0x198] sm:$0xff]  }
  0x85   : > { %3080 = vmatprep.subr.bf16.mxu0 %v3413_v0  ;;  %3107 = vmatpush3.bf16.msra.mxu1 %v3412_v2  ;;  %v3450_v0 = vld [vmem:[%s4263_s1 + $0x218] sm:$0xff]   ;;  %v3451_v2 = vld [vmem:[%s4263_s1 + $0x1a0] sm:$0xff]  }
  0x86   : > { %3108 = vmatprep.subr.bf16.mxu1 %v3415_v4  ;;  %v3453_v4 = vld [vmem:[%s4263_s1 + $0x220] sm:$0xff]  }
  0x88   : > { %3081 = vmatpush3.bf16.msra.mxu0 %v3414_v1  ;;  %v1497_v1 = vsel %vm251_vm0, %v1492_v58, %v1496_v62 }
  0x89   : > { %3082 = vmatprep.subr.bf16.mxu0 %v3417_v6  ;;  %3109 = vmatpush3.bf16.msra.mxu1 %v3416_v5  ;;  %v3454_v5 = vld [vmem:[%s4263_s1 + $0x1a8] sm:$0xff]   ;;  %v3455_v6 = vld [vmem:[%s4263_s1 + $0x1f0] sm:$0xff]  }
  0x8a   : > { %3110 = vmatprep.subr.bf16.mxu1 %v3421_v12  ;;  %v3462_v12 = vld [vmem:[%s3764_s14 + $0x44] sm:$0xff]  }
  0x8b   : > { %v1577_v16 = vshll.u32 %v3462_v12, 16  ;;  %v1581_v22 = vshrl.u32 %v3462_v12, 16 }
  0x8c   : > { %3083 = vmatpush3.bf16.msra.mxu0 %v3419_v8  ;;  %v3457_v8 = vld [vmem:[%s4263_s1 + $0x1b0] sm:$0xff]  }
  0x8d   : > { %3084 = vmatprep.subr.bf16.mxu0 %v3423_v15  ;;  %3111 = vmatpush3.bf16.msra.mxu1 %v3422_v14  ;;  %v1570_v14 = vshrl.u32 %v3461_v11, 16  ;;  %v1572_v15 = vshll.u32 %v3461_v11, 16  ;;  %v1579_v19 = vrot.slane %v1577_v16, 1 }
  0x8e   : > { %3112 = vmatprep.subr.bf16.mxu1 %v3425_v18 }
  0x8f   : > { %v1574_v18 = vrot.slane %v1572_v15, 1  ;;  %v1583_v32 = vor.u32 %v1581_v22, %v1579_v19 }
  0x90   : > { %3085 = vmatpush3.bf16.msra.mxu0 %v3424_v17  ;;  %v3464_v17 = vld [vmem:[%s4263_s1 + $0x238] sm:$0xff]  }
  0x91   : > { %3113 = vmatpush3.bf16.msra.mxu1 %v3427_v20  ;;  %3126 = vmatprep.subr.bf16.mxu0 %v3430_v23  ;;  %v3465_v20 = vld [vmem:[%s3764_s14 + $0x3c] sm:$0xfe]   ;;  %v1575_v23 = vor.u32 %v1574_v18, %v1570_v14  ;;  %v1588_v36 = vsel %vm251_vm0, %v1583_v32, %v1587_v35 }
  0x92   : > { %3184 = vmatprep.subr.bf16.mxu1 %v3437_v38  ;;  %v1611_v26 = vrot.slane %v3465_v20, 1 }
  0x93   : > { %2296 = vmatmul.mubr.bf16.vlgmr.msra.gmra.mrb[20].mxu0 %v1435_v27  ;;  %v1612_v27 = vrot.slane %v3466_v21, 1  ;;  %v1580_v29 = vsel %vm251_vm0, %v1575_v23, %v1579_v19 }
  0x94   : > { %3127 = vmatpush3.bf16.msra.mxu0 %v3433_v30  ;;  %2303 = vmatprep.mubr.bf16.mxu0 %v3439_v42  ;;  %v1614_v30 = vrot.slane %v3467_v25, 1 }
  0x95   : > { %3128 = vmatprep.subr.bf16.mxu0 %v3436_v37  ;;  %2345 = vmatmul.mubr.bf16.vlgmr.msra.gmra.mrb[24].mxu1 %v1489_v48  ;;  %v1613_v31 = vsel %vm294_vm1, %v1611_v26, %v1612_v27  ;;  %v3469_v37 = vld [vmem:[%s3764_s14 + $0x44] sm:$0xff]  }
  0x96   : > { %3185 = vmatpush3.bf16.msra.mxu1 %v3437_v38  ;;  %2352 = vmatprep.mubr.bf16.mxu1 %v1524_v57  ;;  %v1615_v34 = vsel %vm294_vm1, %v1612_v27, %v1614_v30 }
  0x97   : > { %3186 = vmatprep.subr.bf16.mxu1 %v3442_v47 }
  0x98   : > { %3129 = vmatpush3.bf16.msra.mxu0 %v3438_v40 }
  0x99   : > { %3130 = vmatprep.subr.bf16.mxu0 %v3441_v44 }
  0x9a   : > { %3187 = vmatpush3.bf16.msra.mxu1 %v3442_v47 }
  0x9b   : > { %2304 = vmatmul.mubr.bf16.gmra.mrb[24].mxu0 %v1437_v53  ;;  %3188 = vmatprep.subr.bf16.mxu1 %v3447_v60 }
  0x9c   : > { %3131 = vmatpush3.bf16.msra.mxu0 %v3444_v51  ;;  %2393 = vmatprep.mubr.bf16.mxu0 %v1580_v29 }
  0x9d   : > { %3132 = vmatprep.subr.bf16.mxu0 %v3446_v56  ;;  %2353 = vmatmul.mubr.bf16.gmra.mrb[28].mxu1 %v1497_v1 }
  0x9e   : > { %3189 = vmatpush3.bf16.msra.mxu1 %v3447_v60  ;;  %3200 = vmatprep.mubr.bf16.mxu1 %v1613_v31 }
  0x9f   : > { %3190 = vmatprep.subr.bf16.mxu1 %v3450_v0 }
  0xa0   : > { %3133 = vmatpush3.bf16.msra.mxu0 %v3448_v61 }
  0xa1   : > { %3134 = vmatprep.subr.bf16.mxu0 %v3449_v63 }
  0xa2   : > { %3191 = vmatpush3.bf16.msra.mxu1 %v3450_v0 }
  0xa3   : > { %3192 = vmatprep.subr.bf16.mxu1 %v3453_v4 }
  0xa4   : > { %3135 = vmatpush3.bf16.msra.mxu0 %v3451_v2 }
  0xa5   : > { %3136 = vmatprep.subr.bf16.mxu0 %v3452_v3 }
  0xa6   : > { %3193 = vmatpush3.bf16.msra.mxu1 %v3453_v4 }
  0xa7   : > { %3194 = vmatprep.subr.bf16.mxu1 %v3456_v7 }
  0xa8   : > { %3137 = vmatpush3.bf16.msra.mxu0 %v3454_v5 }
  0xa9   : > { %3138 = vmatprep.subr.bf16.mxu0 %v3455_v6 }
  0xaa   : > { %3195 = vmatpush3.bf16.msra.mxu1 %v3456_v7 }
  0xab   : > { %3196 = vmatprep.subr.bf16.mxu1 %v3459_v10 }
  0xac   : > { %3139 = vmatpush3.bf16.msra.mxu0 %v3457_v8 }
  0xad   : > { %3140 = vmatprep.subr.bf16.mxu0 %v3458_v9 }
  0xae   : > { %3197 = vmatpush3.bf16.msra.mxu1 %v3459_v10 }
  0xaf   : > { %3198 = vmatprep.subr.bf16.mxu1 %v3464_v17 }
  0xb0   : > { %3141 = vmatpush3.bf16.msra.mxu0 %v3460_v13 }
  0xb2   : > { %3199 = vmatpush3.bf16.msra.mxu1 %v3464_v17 }
  0xb3   : > { %2394 = vmatmul.mubr.bf16.vlgmr.msra.gmra.mrb[28].mxu0 %v3463_v24 }
  0xb4   : > { %2401 = vmatprep.mubr.bf16.mxu0 %v1588_v36 }
  0xb5   : > { %3201 = vmatmul.mubr.bf16.vlgmr.msra.gmra.mrb[32].mxu1 %v1615_v34 }
  0xbb   : > { %2402 = vmatmul.mubr.bf16.gmra.mrb[32].mxu0 %v3469_v37 }
 0x106   : > { %v2936_v38 = vpop.f32.mrb[0].mxu0 }
 0x107   : > { %v2964_v39 = vpop.f32.mrb[0].mxu1  ;;  %v2937_v40 = vpop.f32.mrb[1].mxu0 }
 0x108   : > { %v2965_v41 = vpop.f32.mrb[1].mxu1  ;;  %v2938_v42 = vadd.f32 %v2937_v40, %v2936_v38  ;;  %v2939_v44 = vpop.f32.mrb[2].mxu0 }
 0x109   : > { %v2966_v43 = vadd.f32 %v2965_v41, %v2964_v39  ;;  %v2967_v45 = vpop.f32.mrb[2].mxu1  ;;  %v2940_v46 = vpop.f32.mrb[3].mxu0 }
 0x10a   : > { %v2968_v47 = vpop.f32.mrb[3].mxu1  ;;  %v2941_v49 = vadd.f32 %v2940_v46, %v2939_v44 }
 0x10b   : > { %v1164_v48 = vadd.f32 %v2966_v43, %v2938_v42  ;;  %v2969_v50 = vadd.f32 %v2968_v47, %v2967_v45 }
 0x10d   : > { %v1167_v51 = vadd.f32 %v2969_v50, %v2941_v49 }
 0x10e   : > { %v2942_v52 = vpop.f32.mrb[4].mxu0 }
 0x10f   : > { %v2970_v53 = vpop.f32.mrb[4].mxu1  ;;  %v2943_v54 = vpop.f32.mrb[5].mxu0 }
 0x110   : > { %v2971_v55 = vpop.f32.mrb[5].mxu1  ;;  %v2944_v56 = vadd.f32 %v2943_v54, %v2942_v52  ;;  %v2945_v58 = vpop.f32.mrb[6].mxu0 }
 0x111   : > { %v2972_v57 = vadd.f32 %v2971_v55, %v2970_v53  ;;  %v2973_v59 = vpop.f32.mrb[6].mxu1  ;;  %v2946_v60 = vpop.f32.mrb[7].mxu0 }
 0x112   : > { %v2974_v61 = vpop.f32.mrb[7].mxu1  ;;  %v2947_v63 = vadd.f32 %v2946_v60, %v2945_v58 }
 0x113   : > { %v1172_v62 = vadd.f32 %v2972_v57, %v2944_v56  ;;  %v2975_v0 = vadd.f32 %v2974_v61, %v2973_v59 }
 0x115   : > { %v1175_v1 = vadd.f32 %v2975_v0, %v2947_v63 }
 0x126   : > { %v2992_v2 = vpop.f32.mrb[8].mxu0 }
 0x127   : > { %v2993_v3 = vpop.f32.mrb[9].mxu0  ;;  %v3020_v6 = vpop.f32.mrb[8].mxu1 }
 0x128   : > { %v2994_v4 = vadd.f32 %v2993_v3, %v2992_v2  ;;  %v2995_v5 = vpop.f32.mrb[10].mxu0  ;;  %v3021_v10 = vpop.f32.mrb[9].mxu1 }
 0x129   : > { %v2996_v7 = vpop.f32.mrb[11].mxu0  ;;  %v3022_v11 = vadd.f32 %v3021_v10, %v3020_v6  ;;  %v3023_v12 = vpop.f32.mrb[10].mxu1 }
 0x12a   : > { %v1213_v8 = vadd.f32 %v2994_v4, %v1164_v48  ;;  %v2997_v9 = vadd.f32 %v2996_v7, %v2995_v5  ;;  %v3024_v14 = vpop.f32.mrb[11].mxu1 }
 0x12b   : > { %v3025_v15 = vadd.f32 %v3024_v14, %v3023_v12 }
 0x12c   : > { %v1216_v13 = vadd.f32 %v2997_v9, %v1167_v51  ;;  %v1262_v16 = vadd.f32 %v3022_v11, %v1213_v8 }
 0x12e   : > { %v1265_v17 = vadd.f32 %v3025_v15, %v1216_v13  ;;  %v2998_v18 = vpop.f32.mrb[12].mxu0 }
 0x12f   : > { %v2999_v19 = vpop.f32.mrb[13].mxu0  ;;  %v3026_v22 = vpop.f32.mrb[12].mxu1 }
 0x130   : > { %v3000_v20 = vadd.f32 %v2999_v19, %v2998_v18  ;;  %v3001_v21 = vpop.f32.mrb[14].mxu0  ;;  %v3027_v26 = vpop.f32.mrb[13].mxu1 }
 0x131   : > { %v3002_v23 = vpop.f32.mrb[15].mxu0  ;;  %v3028_v27 = vadd.f32 %v3027_v26, %v3026_v22  ;;  %v3029_v28 = vpop.f32.mrb[14].mxu1  ;;  %v2760_v22 = vld [vmem:[%s4264_s2] ss:$0 sm:$0xff] }
 0x132   : > { %v1221_v24 = vadd.f32 %v3000_v20, %v1172_v62  ;;  %v3003_v25 = vadd.f32 %v3002_v23, %v3001_v21  ;;  %v3030_v30 = vpop.f32.mrb[15].mxu1 }
 0x133   : > { %v3031_v31 = vadd.f32 %v3030_v30, %v3029_v28 }
 0x134   : > { %v1224_v29 = vadd.f32 %v3003_v25, %v1175_v1  ;;  %v1270_v32 = vadd.f32 %v3028_v27, %v1221_v24 }
 0x136   : > { %v1273_v33 = vadd.f32 %v3031_v31, %v1224_v29  ;;  %v2761_v29 = vld [vmem:[%s4265_s3] ss:$0 sm:$0xff] }
 0x146   : > { %v3182_v34 = vpop.f32.mrb[16].mxu0 }
 0x147   : > { %v4188_v35 = vadd.f32 %v3182_v34, %v1270_v32  ;;  %v1310_v36 = vpop.f32.mrb[17].mxu0  ;;  %v3058_v42 = vpop.f32.mrb[16].mxu1 }
 0x148   : > { %v1311_v37 = vadd.f32 %v1310_v36, %v1262_v16  ;;  %v3183_v38 = vpop.f32.mrb[18].mxu0  ;;  %v3059_v43 = vpop.f32.mrb[17].mxu1 }
 0x149   : > { %v4190_v39 = vadd.f32 %v3183_v38, %v1273_v33  ;;  %v1313_v40 = vpop.f32.mrb[19].mxu0  ;;  %v3060_v44 = vadd.f32 %v3059_v43, %v3058_v42  ;;  %v3061_v45 = vpop.f32.mrb[18].mxu1 }
 0x14a   : > { %v1314_v41 = vadd.f32 %v1313_v40, %v1265_v17  ;;  %v3062_v46 = vpop.f32.mrb[19].mxu1  ;;  %v1332_v27 = vmul.f32 %v2760_v22, %v1311_v37 }
 0x14b   : > { %v3063_v47 = vadd.f32 %v3062_v46, %v3061_v45 }
 0x14c   : > { %v1333_v33 = vmul.f32 %v2760_v22, %v1314_v41  ;;  %v1343_v42 = vadd.f32 %v2761_v29, %v1332_v27 }
 0x14f   : > { %v3064_v48 = vpop.f32.mrb[20].mxu1 }
 0x150   : > { %v3065_v49 = vpop.f32.mrb[21].mxu1 }
 0x151   : > { %v3066_v50 = vadd.f32 %v3065_v49, %v3064_v48  ;;  %v3067_v51 = vpop.f32.mrb[22].mxu1 }
 0x152   : > { %v3068_v52 = vpop.f32.mrb[23].mxu1 }
 0x153   : > { %v3069_v53 = vadd.f32 %v3068_v52, %v3067_v51  ;;  %v1334_v52 = vmul.f32 %v2760_v22, %v4188_v35 }
 0x166   : > { %v3086_v54 = vpop.f32.mrb[20].mxu0 }
 0x167   : > { %v3087_v55 = vpop.f32.mrb[21].mxu0 }
 0x168   : > { %v3088_v56 = vadd.f32 %v3087_v55, %v3086_v54  ;;  %v3089_v57 = vpop.f32.mrb[22].mxu0  ;;  %v3114_v62 = vpop.f32.mrb[24].mxu1 }
 0x169   : > { %v3090_v58 = vpop.f32.mrb[23].mxu0  ;;  %v3115_v63 = vpop.f32.mrb[25].mxu1 }
 0x16a   : > { %v2298_v59 = vadd.f32 %v3088_v56, %v3060_v44  ;;  %v3091_v60 = vadd.f32 %v3090_v58, %v3089_v57  ;;  %v3116_v0 = vadd.f32 %v3115_v63, %v3114_v62  ;;  %v3117_v1 = vpop.f32.mrb[26].mxu1  ;;  %v1335_v58 = vmul.f32 %v2760_v22, %v4190_v39 }
 0x16b   : > { %v3118_v3 = vpop.f32.mrb[27].mxu1 }
 0x16c   : > { %v2301_v61 = vadd.f32 %v3091_v60, %v3063_v47  ;;  %v2347_v5 = vadd.f32 %v3116_v0, %v2298_v59  ;;  %v3119_v6 = vadd.f32 %v3118_v3, %v3117_v1  ;;  %v1344_v47 = vadd.f32 %v2761_v29, %v1333_v33 }
 0x16d   : > { %v1345_v0 = vadd.f32 %v2761_v29, %v1334_v52  ;;  %v1346_v35 = vadd.f32 %v2761_v29, %v1335_v58 }
 0x16e   : > { %v3092_v2 = vpop.f32.mrb[24].mxu0  ;;  %v2350_v10 = vadd.f32 %v3119_v6, %v2301_v61  ;;  %v1348_v59 = vmax.f32 %v1344_v47, 0.0 }
 0x16f   : > { %v3093_v4 = vpop.f32.mrb[25].mxu0  ;;  %v1349_v6 = vmax.f32 %v1345_v0, 0.0 }
 0x170   : > { %v3094_v7 = vadd.f32 %v3093_v4, %v3092_v2  ;;  %v3095_v8 = vpop.f32.mrb[26].mxu0  ;;  %v3120_v13 = vpop.f32.mrb[28].mxu1 }
 0x171   : > { %v3096_v9 = vpop.f32.mrb[27].mxu0  ;;  %v3121_v15 = vpop.f32.mrb[29].mxu1 }
 0x172   : > { %v2306_v11 = vadd.f32 %v3094_v7, %v3066_v50  ;;  %v3097_v12 = vadd.f32 %v3096_v9, %v3095_v8  ;;  %v3122_v16 = vadd.f32 %v3121_v15, %v3120_v13  ;;  %v3123_v17 = vpop.f32.mrb[30].mxu1  ;;  %v1350_v8 = vmax.f32 %v1346_v35, 0.0 }
 0x173   : > { %v3124_v18 = vpop.f32.mrb[31].mxu1 }
 0x174   : > { %v2309_v14 = vadd.f32 %v3097_v12, %v3069_v53  ;;  %v2355_v19 = vadd.f32 %v3122_v16, %v2306_v11  ;;  %v3125_v20 = vadd.f32 %v3124_v18, %v3123_v17  ;;  %v1347_v53 = vmax.f32 %v1343_v42, 0.0 }
 0x176   : > { %v2358_v21 = vadd.f32 %v3125_v20, %v2309_v14 }
 0x186   : > { %v3142_v23 = vpop.f32.mrb[28].mxu0 }
 0x187   : > { %v3143_v24 = vpop.f32.mrb[29].mxu0 }
 0x188   : > { %v3144_v25 = vadd.f32 %v3143_v24, %v3142_v23  ;;  %v3145_v26 = vpop.f32.mrb[30].mxu0  ;;  %v3202_v31 = vpop.f32.mrb[32].mxu1 }
 0x189   : > { %v3146_v28 = vpop.f32.mrb[31].mxu0  ;;  %v2444_v34 = vpop.f32.mrb[33].mxu1 }
 0x18a   : > { %v3147_v30 = vadd.f32 %v3146_v28, %v3145_v26  ;;  %v2396_v32 = vadd.f32 %v3144_v25, %v2347_v5  ;;  %v3203_v38 = vpop.f32.mrb[34].mxu1 }
 0x18b   : > { %v2447_v43 = vpop.f32.mrb[35].mxu1 }
 0x18c   : > { %v2445_v36 = vadd.f32 %v2444_v34, %v2396_v32  ;;  %v2399_v40 = vadd.f32 %v3147_v30, %v2350_v10 }
 0x18e   : > { %v2466_v44 = vmul.f32 %v2760_v22, %v2445_v36  ;;  %v2448_v45 = vadd.f32 %v2447_v43, %v2399_v40  ;;  %v3148_v46 = vpop.f32.mrb[32].mxu0 }
 0x18f   : > { %v3149_v37 = vpop.f32.mrb[33].mxu0 }
 0x190   : > { %v2477_v48 = vadd.f32 %v2761_v29, %v2466_v44  ;;  %v2467_v49 = vmul.f32 %v2760_v22, %v2448_v45  ;;  %v3150_v50 = vadd.f32 %v3149_v37, %v3148_v46  ;;  %v3151_v51 = vpop.f32.mrb[34].mxu0 }
 0x191   : > { %v3152_v54 = vpop.f32.mrb[35].mxu0 }
 0x192   : > { %v2481_v41 = vmax.f32 %v2477_v48, 0.0  ;;  %v2478_v55 = vadd.f32 %v2761_v29, %v2467_v49  ;;  %v2404_v56 = vadd.f32 %v3150_v50, %v2355_v19  ;;  %v3153_v57 = vadd.f32 %v3152_v54, %v3151_v51 }
 0x194   : > { %v2489_v60 = vmax.f32 %v1347_v53, %v2481_v41  ;;  %v2482_v61 = vmax.f32 %v2478_v55, 0.0  ;;  %v2453_v62 = vadd.f32 %v3202_v31, %v2404_v56  ;;  %v2407_v63 = vadd.f32 %v3153_v57, %v2358_v21 }
 0x196   : > { %2493 = vst [vmem:[#allocation3] sm:$0xff] %v2489_v60  ;;  %v2490_v1 = vmax.f32 %v1348_v59, %v2482_v61  ;;  %v2468_v2 = vmul.f32 %v2760_v22, %v2453_v62  ;;  %v2456_v3 = vadd.f32 %v3203_v38, %v2407_v63 }
 0x198   : > { %2494 = vst [vmem:[#allocation3 + $0x8] sm:$0xff] %v2490_v1  ;;  %v2479_v4 = vadd.f32 %v2761_v29, %v2468_v2  ;;  %v2469_v5 = vmul.f32 %v2760_v22, %v2456_v3 }
 0x19a   : > { %v2483_v7 = vmax.f32 %v2479_v4, 0.0  ;;  %v2480_v39 = vadd.f32 %v2761_v29, %v2469_v5 }
 0x19c   : > { %v2491_v9 = vmax.f32 %v1349_v6, %v2483_v7  ;;  %v2484_v10 = vmax.f32 %v2480_v39, 0.0 }
 0x19e   : > { %2495 = vst [vmem:[#allocation3 + $0x10] sm:$0xff] %v2491_v9  ;;  %v2492_v11 = vmax.f32 %v1350_v8, %v2484_v10 }
 0x19f   : > { %v2497_v12 = vld [vmem:[#allocation3] ss:$2 sm:$0xff]  ;;  %v2501_v13 = vld [vmem:[#allocation3 + $0x1] ss:$2 sm:$0xff] }
 0x1a0   : > { %2496 = vst [vmem:[#allocation3 + $0x18] sm:$0xff] %v2492_v11  ;;  %v2504_v16 = vmax.f32 %v2497_v12, %v2501_v13 }
 0x1a7   : > { %v2499_v14 = vld [vmem:[#allocation3 + $0x10] ss:$2 sm:$0xff]  ;;  %v2503_v15 = vld [vmem:[#allocation3 + $0x11] ss:$2 sm:$0xff] }
 0x1a8   : > { %v2505_v17 = vmax.f32 %v2499_v14, %v2503_v15 }
 0x1aa   : > { %v2918_v18 = vpack.c.bf16 %v2505_v17, %v2504_v16 }
 0x1ac   : > { %2919 = vst [vmem:[%s204_s6] sm:$0xff] %v2918_v18  }
 0x1ad   : > { %3483 = shalt.err (!%p3480_p6)
}
 0x1ae   : > { %s3484_s23 = scalar_lea.hbm %s4206_s11, 128  ;;  %s3488_s27 = scalar_lea.hbm %s4266_s4, 4096 }
 0x1af   : > { %p3485_p7 = scmp.ne.s32.totalorder %s4206_s11, %s3484_s23  ;;  %p3489_p11 = scmp.lt.u32.totalorder %s4206_s11, %s4266_s4 }
 0x1b0   : > { %p3490_p12 = scmp.lt.u32.totalorder %s3488_s27, %s3484_s23  ;;  %p3492_p0 = scmp.lt.u32.totalorder %s3484_s23, %s4206_s11 }
 0x1b1   : > { %p3486_p9 = pnand %p3485_p7, %p3645_p3 }
 0x1b2   : > { %p3491_p13 = por %p3490_p12, %p3489_p11 }
 0x1b3   : > { %p3487_p10 = pneg %p3486_p9 }
 0x1b4   : > { %p3493_p1 = por %p3492_p0, %p3491_p13 }
 0x1b6   : > { %p3494_p2 = pnand %p3493_p1, %p3487_p10 }
 0x1b8   : > { %3497 = shalt.err (!%p3494_p2)
}
 0x1b9   : > { %s3567_s10 = smov 64   ;;  %s3568_s14 = smov 4  }
 0x1ba   : > { %3205 = dma.vmem_to_hbm [thread:$0]  (%p3645_p3), %s4208_s8, 128, %s4206_s11, %s4210_s18, %s3567_s10, %s3567_s10, %s3568_s14  }
 0x1bb PF: > { %p3211_p4 = scmp.ge.s32.totalorder %s3564_s22, 2  ;;  %s2547_s19 = sand.u32 1, %s3536_s15  }
 0x1bc   : > { %s2548_s12 = scalar_lea.sflag [#allocation5], %s2547_s19 }
 0x1bd   : > { %p3208_p5 = pnand %p3211_p4, %p3654_p8 }
 0x1bf   : > { %3531 = dma.done.wait (!%p3208_p5), %s2548_s12, 128  }
 0x1c0   : > { %3533 = vsyncadd (!%p3208_p5), %s2548_s12, 4294967168  ;;  %s17_s22 = sadd.s32 1, %s3564_s22   ;;  %s4269_s15 = smov %s3540_s16 }
 0x1c1   : > { %p14_p6 = scmp.ge.s32.totalorder %s17_s22, 34   ;;  %s4270_s16 = smov %s3544_s17 }
 0x1c2   : > { %s4271_s17 = smov %s3663_s7  ;;  %s4272_s18 = smov %s3556_s20 }
 0x1c3   : > { %s4273_s19 = smov %s3560_s21  ;;  %s4274_s20 = smov %s4277_s25 }
 0x1c4   : > { %s4275_s21 = smov %s4281_s26  ;;  %16 = sbr.rel (!%p14_p6) target bundleno = 5 (0x5), region = 78 }
 0x1cb   :  { %2553 = vsyncpa [#allocation5], 1 }
 0x1cc   :  { %2555 = vsyncpa [#allocation5 + $0x1], 1 }

</bundles_post_ra>
